<compile_context>
chip_gen: v6e
topology: v6e:2x2x1
jax: 0.10.0
libtpu: 0.0.40
codegen_flags: <defaults>
</compile_context>

<pallas_src>
import functools

import jax
import jax.numpy as jnp
from jax.experimental import pallas as pl
from jax.experimental.pallas import tpu as pltpu


def _lrelu(v):
    # LeakyReLU(negative_slope=0.01)
    return jnp.where(v > 0, v, 0.01 * v)


def _round_up(x, m):
    return ((x + m - 1) // m) * m


# ----------------------------------------------------------------------------
# Kernel
# ----------------------------------------------------------------------------
def dueling_dqn_kernel(
    x_ref,
    w1, b1, w2, b2, w3, b3,            # feature network (w1 f32 / K padded, w2-w3 bf16)
    w_va1, b_va1,                      # fused value|advantage layer 1 (column concat, bf16)
    w_va2, b_va2,                      # fused layer 2 (block diagonal, bf16)
    w_va3, b_va3,                      # fused layer 3: cols = [adv | value | 0-pad to 128], bf16
    out_ref,
    *,
    n_act,
):
    x = x_ref[...]

    # ---- feature_network: Linear -> LeakyReLU -> (Dropout=id) x2 -> Linear -> LeakyReLU
    # Elementwise math stays f32; only matmul operands go to the MXU in bf16.
    h = _lrelu(jnp.dot(x, w1[...], preferred_element_type=jnp.float32) + b1[...])
    h = _lrelu(jnp.dot(h.astype(jnp.bfloat16), w2[...],
                       preferred_element_type=jnp.float32) + b2[...])
    h = _lrelu(jnp.dot(h.astype(jnp.bfloat16), w3[...],
                       preferred_element_type=jnp.float32) + b3[...])

    # ---- fused value/advantage streams (3 full-width matmuls instead of 6 narrow)
    va = _lrelu(jnp.dot(h.astype(jnp.bfloat16), w_va1[...],
                        preferred_element_type=jnp.float32) + b_va1[...])
    va = _lrelu(jnp.dot(va.astype(jnp.bfloat16), w_va2[...],
                        preferred_element_type=jnp.float32) + b_va2[...])
    va = jnp.dot(va.astype(jnp.bfloat16), w_va3[...],
                 preferred_element_type=jnp.float32) + b_va3[...]

    # layer-3 columns: [advantage(n_act) | value(1) | zero pad]
    a = va[:, :n_act]                  # advantages start at lane 0 (no lane-offset slice)
    v = va[:, n_act:n_act + 1]         # value stream output

    # ---- dueling combine: values + (adv - mean) / (std_unbiased + 1e-6)
    a_mean = jnp.mean(a, axis=-1, keepdims=True)
    diff = a - a_mean
    a_var = jnp.sum(diff * diff, axis=-1, keepdims=True) * (1.0 / (n_act - 1))  # ddof=1
    a_std = jnp.sqrt(a_var) + 1e-6
    inv_std = pl.reciprocal(a_std, approx=False)   # exact divide semantics, EUP slot

    # Lane-dense 128-wide store; lanes >= n_act are don't-care and sliced off in the wrapper.
    out_ref[...] = v + (va - a_mean) * inv_std


# ----------------------------------------------------------------------------
# One-time parameter preparation (hoisted out of the forward path)
# ----------------------------------------------------------------------------
def prepare_fused_params(params, lane=128, sublane=8):
    """Fuse the value/advantage streams, pad layouts, and cast big weights to bf16.

    Returns (fused_params, n_actions). Call once at parameter-creation time.
    """
    (w1, b1, w2, b2, w3, b3,
     wv1, bv1, wv2, bv2, wv3, bv3,
     wa1, ba1, wa2, ba2, wa3, ba3) = params

    n_act = wa3.shape[1]
    assert n_act >= 2, "n_actions must be >= 2 (unbiased std uses ddof=1)"

    f32, bf16 = jnp.float32, jnp.bfloat16

    # Layer 1 keeps f32 weights (K=6 is negligible FLOPs); K padded 6 -> 8 so the
    # first matmul runs on an aligned sublane tile (matching x pad in the wrapper).
    din = w1.shape[0]
    k_pad = _round_up(din, sublane)
    w1p = jnp.zeros((k_pad, w1.shape[1]), f32).at[:din].set(w1.astype(f32))

    # Big feature-net layers (~70% of FLOPs) -> bf16 weights, f32 accumulate in kernel.
    w2b, w3b = w2.astype(bf16), w3.astype(bf16)

    # VA layer 1: column concat (256,128)|(256,128) -> (256,256); cols = [value | adv]
    w_va1 = jnp.concatenate([wv1, wa1], axis=1).astype(bf16)
    b_va1 = jnp.concatenate([bv1, ba1], axis=1).astype(f32)

    # VA layer 2: block diagonal (128,64)+(128,64) -> (256,128); cols = [value | adv]
    rv, ra = wv2.shape[0], wa2.shape[0]
    cv, ca = wv2.shape[1], wa2.shape[1]
    w_va2 = jnp.zeros((rv + ra, cv + ca), f32)
    w_va2 = w_va2.at[:rv, :cv].set(wv2).at[rv:, cv:].set(wa2).astype(bf16)
    b_va2 = jnp.concatenate([bv2, ba2], axis=1).astype(f32)

    # VA layer 3: block diagonal, output columns reordered to [adv | value] and padded
    # to 128 lanes so the kernel's output store is lane-dense and the advantage slice
    # starts at lane 0. Extra zero rows/cols cost no extra MXU cycles.
    rv3 = wv3.shape[0]
    ra3 = wa3.shape[0]
    n_cols = _round_up(n_act + 1, lane)
    w_va3 = jnp.zeros((rv3 + ra3, n_cols), f32)
    w_va3 = w_va3.at[:rv3, n_act:n_act + 1].set(wv3)      # value rows -> value column
    w_va3 = w_va3.at[rv3:, :n_act].set(wa3)               # adv rows   -> adv columns
    w_va3 = w_va3.astype(bf16)
    b_va3 = jnp.zeros((1, n_cols), f32)
    b_va3 = b_va3.at[:, :n_act].set(ba3).at[:, n_act:n_act + 1].set(bv3)

    fused = (w1p, b1.astype(f32), w2b, b2.astype(f32), w3b, b3.astype(f32),
             w_va1, b_va1, w_va2, b_va2, w_va3, b_va3)
    return fused, n_act


# ----------------------------------------------------------------------------
# Forward wrapper
# ----------------------------------------------------------------------------
def dueling_dqn_forward(x, fused_params, n_act, block_b=None):
    w1p = fused_params[0]
    w_va3 = fused_params[10]
    k_pad = w1p.shape[0]
    n_pad = w_va3.shape[1]      # 128 (lane-dense output width)

    B, din = x.shape

    # Batch tile: multiple of 8 sublanes; at least 2 grid steps whenever B allows it
    # (so dimension_semantics=("parallel",) can shard across both TCs on v7x), capped
    # at 1024 rows so the largest live intermediate (block_b, 512) f32 stays ~2 MB —
    # well inside the scoped VMEM limit on v5e/v6e/v7x.
    if block_b is None:
        block_b = min(1024, _round_up(max((B + 1) // 2, 8), 8))
    block_b = max(8, _round_up(block_b, 8))
    b_pad = _round_up(B, block_b)

    # Single cheap (b_pad, 8) copy: batch pad to a tile multiple + feature pad 6 -> 8.
    # The K pad is kept host-side so the first matmul sees an aligned contracting dim.
    x_p = jnp.zeros((b_pad, k_pad), jnp.float32).at[:B, :din].set(x)

    grid = (b_pad // block_b,)

    # Weights/biases: constant block index -> DMA'd once, VMEM-resident across all
    # batch tiles (~0.8 MB in bf16).
    # TODO(synk): pipeline_mode=pl.Buffered(1) on these constant-index specs would drop
    # their (pointless) double buffer on v7x; left at default for lowering portability.
    weight_specs = [pl.BlockSpec(p.shape, lambda i: (0, 0)) for p in fused_params]
    in_specs = [pl.BlockSpec((block_b, k_pad), lambda i: (i, 0))] + weight_specs
    out_specs = pl.BlockSpec((block_b, n_pad), lambda i: (i, 0))

    out = pl.pallas_call(
        functools.partial(dueling_dqn_kernel, n_act=n_act),
        out_shape=jax.ShapeDtypeStruct((b_pad, n_pad), jnp.float32),
        grid=grid,
        in_specs=in_specs,
        out_specs=out_specs,
        compiler_params=pltpu.CompilerParams(
            dimension_semantics=("parallel",),
        ),
    )(x_p, *fused_params)

    return out[:B, :n_act]


# ----------------------------------------------------------------------------
# Synthetic init + pure-JAX references
# ----------------------------------------------------------------------------
def init_params(key, n_input=6, n_output=4, layer=256):
    """Deterministic synthetic init mirroring the module's Linear shapes.

    PyTorch init is orthogonal(gain=1/sqrt(weight.size(0))); here a deterministic
    scaled-normal of the same shapes is used (synthetic kernel, no checkpoint).
    Weights stored as (in_features, out_features) = W_pytorch.T so y = x @ W + b.
    """
    dims = [
        (n_input, layer), (layer, layer * 2), (layer * 2, layer),            # features
        (layer, layer // 2), (layer // 2, layer // 4), (layer // 4, 1),       # value
        (layer, layer // 2), (layer // 2, layer // 4), (layer // 4, n_output),  # advantage
    ]
    params = []
    for (din, dout) in dims:
        key, k = jax.random.split(key)
        scale = 1.0 / jnp.sqrt(jnp.float32(dout))   # fan_in = weight.size(0) = out_features
        w = jax.random.normal(k, (din, dout), jnp.float32) * scale / jnp.sqrt(jnp.float32(din))
        b = jnp.zeros((1, dout), jnp.float32)       # bias init = 0.0 (matches module)
        params += [w, b]
    return tuple(params)


def dueling_dqn_ref_f32(x, params):
    """Module-equivalent forward math in full f32 (documentation / dev reference)."""
    (w1, b1, w2, b2, w3, b3,
     wv1, bv1, wv2, bv2, wv3, bv3,
     wa1, ba1, wa2, ba2, wa3, ba3) = params
    h = _lrelu(x @ w1 + b1)
    h = _lrelu(h @ w2 + b2)
    h = _lrelu(h @ w3 + b3)
    v = _lrelu(h @ wv1 + bv1)
    v = _lrelu(v @ wv2 + bv2)
    v = v @ wv3 + bv3
    a = _lrelu(h @ wa1 + ba1)
    a = _lrelu(a @ wa2 + ba2)
    a = a @ wa3 + ba3
    mean = jnp.mean(a, axis=1, keepdims=True)
    std = jnp.std(a, axis=1, keepdims=True, ddof=1) + 1e-6
    return v + (a - mean) / std


def _mm_bf16(a, w):
    return jnp.dot(a.astype(jnp.bfloat16), w.astype(jnp.bfloat16),
                   preferred_element_type=jnp.float32)


def dueling_dqn_ref_bf16(x, params):
    """Precision-matched reference: bf16 matmul operands, f32 accumulate/elementwise
    (same mixed precision as the kernel), module-equivalent structure."""
    (w1, b1, w2, b2, w3, b3,
     wv1, bv1, wv2, bv2, wv3, bv3,
     wa1, ba1, wa2, ba2, wa3, ba3) = params
    h = _lrelu(x @ w1 + b1)                       # first layer stays f32 (matches kernel)
    h = _lrelu(_mm_bf16(h, w2) + b2)
    h = _lrelu(_mm_bf16(h, w3) + b3)
    v = _lrelu(_mm_bf16(h, wv1) + bv1)
    v = _lrelu(_mm_bf16(v, wv2) + bv2)
    v = _mm_bf16(v, wv3) + bv3
    a = _lrelu(_mm_bf16(h, wa1) + ba1)
    a = _lrelu(_mm_bf16(a, wa2) + ba2)
    a = _mm_bf16(a, wa3) + ba3
    mean = jnp.mean(a, axis=1, keepdims=True)
    std = jnp.std(a, axis=1, keepdims=True, ddof=1) + 1e-6
    return v + (a - mean) / std


if __name__ == "__main__":
    key = jax.random.PRNGKey(0)
    k_x, k_p = jax.random.split(key)

    B, N_IN, N_OUT, LAYER = 32, 6, 4, 256
    x = jax.random.normal(k_x, (B, N_IN), jnp.float32)
    params = init_params(k_p, n_input=N_IN, n_output=N_OUT, layer=LAYER)

    # One-time parameter fusion (hoisted out of the forward path).
    fused, n_act = prepare_fused_params(params)

    # Default block_b -> 16-row tiles, 2 grid steps: exercises the batch pipeline,
    # resident weights, and megacore sharding on v7x.
    q = dueling_dqn_forward(x, fused, n_act)
    q = jax.block_until_ready(q)

    # Validate against the precision-matched (bf16-matmul) reference; the fused
    # block-diagonal layers add only exact zeros, so this should agree tightly.
    q_ref = dueling_dqn_ref_bf16(x, params)
    assert q.shape == (B, N_OUT)
    assert jnp.allclose(q, q_ref, atol=5e-3, rtol=5e-3), "mismatch vs bf16-matched reference"

    print("KERNEL_OK")
</pallas_src>

<mosaic_0001>
module attributes {stable_mosaic.version = 11 : i64} {
  func.func @dueling_dqn_kernel(%arg0: i32, %arg1: memref<16x8xf32, #tpu.memory_space<vmem>>, %arg2: memref<8x256xf32, #tpu.memory_space<vmem>>, %arg3: memref<1x256xf32, #tpu.memory_space<vmem>>, %arg4: memref<256x512xbf16, #tpu.memory_space<vmem>>, %arg5: memref<1x512xf32, #tpu.memory_space<vmem>>, %arg6: memref<512x256xbf16, #tpu.memory_space<vmem>>, %arg7: memref<1x256xf32, #tpu.memory_space<vmem>>, %arg8: memref<256x256xbf16, #tpu.memory_space<vmem>>, %arg9: memref<1x256xf32, #tpu.memory_space<vmem>>, %arg10: memref<256x128xbf16, #tpu.memory_space<vmem>>, %arg11: memref<1x128xf32, #tpu.memory_space<vmem>>, %arg12: memref<128x128xbf16, #tpu.memory_space<vmem>>, %arg13: memref<1x128xf32, #tpu.memory_space<vmem>>, %arg14: memref<16x128xf32, #tpu.memory_space<vmem>>) attributes {dimension_semantics = [#tpu.dimension_semantics<parallel>], iteration_bounds = array<i64: 2>, scalar_prefetch = 0 : i64, scratch_operands = 0 : i64, tpu.core_type = #tpu.core_type<tc>, window_params = [{transform_indices = @transform_0, window_bounds = array<i64: 16, 8>}, {pipeline_mode = #tpu.pipeline_mode<synchronous>, transform_indices = @transform_1, window_bounds = array<i64: 8, 256>}, {pipeline_mode = #tpu.pipeline_mode<synchronous>, transform_indices = @transform_2, window_bounds = array<i64: 1, 256>}, {pipeline_mode = #tpu.pipeline_mode<synchronous>, transform_indices = @transform_3, window_bounds = array<i64: 256, 512>}, {pipeline_mode = #tpu.pipeline_mode<synchronous>, transform_indices = @transform_4, window_bounds = array<i64: 1, 512>}, {pipeline_mode = #tpu.pipeline_mode<synchronous>, transform_indices = @transform_5, window_bounds = array<i64: 512, 256>}, {pipeline_mode = #tpu.pipeline_mode<synchronous>, transform_indices = @transform_6, window_bounds = array<i64: 1, 256>}, {pipeline_mode = #tpu.pipeline_mode<synchronous>, transform_indices = @transform_7, window_bounds = array<i64: 256, 256>}, {pipeline_mode = #tpu.pipeline_mode<synchronous>, transform_indices = @transform_8, window_bounds = array<i64: 1, 256>}, {pipeline_mode = #tpu.pipeline_mode<synchronous>, transform_indices = @transform_9, window_bounds = array<i64: 256, 128>}, {pipeline_mode = #tpu.pipeline_mode<synchronous>, transform_indices = @transform_10, window_bounds = array<i64: 1, 128>}, {pipeline_mode = #tpu.pipeline_mode<synchronous>, transform_indices = @transform_11, window_bounds = array<i64: 128, 128>}, {pipeline_mode = #tpu.pipeline_mode<synchronous>, transform_indices = @transform_12, window_bounds = array<i64: 1, 128>}, {transform_indices = @transform_13, window_bounds = array<i64: 16, 128>}]} {
    %c0 = arith.constant 0 : index
    %c0_0 = arith.constant 0 : index
    %0 = vector.load %arg1[%c0, %c0_0] : memref<16x8xf32, #tpu.memory_space<vmem>>, vector<16x8xf32>
    %c0_1 = arith.constant 0 : index
    %c0_2 = arith.constant 0 : index
    %1 = vector.load %arg2[%c0_1, %c0_2] : memref<8x256xf32, #tpu.memory_space<vmem>>, vector<8x256xf32>
    %cst = arith.constant dense<0.000000e+00> : vector<16x256xf32>
    %2 = tpu.matmul %0, %1, %cst {dimension_numbers = #tpu.dot_dimension_numbers<[1], [0], [0], [1], [0, 0, 1, 1], [], []>} : vector<16x8xf32>, vector<8x256xf32>, vector<16x256xf32> -> vector<16x256xf32>
    %c0_3 = arith.constant 0 : index
    %c0_4 = arith.constant 0 : index
    %3 = vector.load %arg3[%c0_3, %c0_4] : memref<1x256xf32, #tpu.memory_space<vmem>>, vector<1x256xf32>
    %4 = vector.broadcast %3 : vector<1x256xf32> to vector<16x256xf32>
    %5 = arith.addf %2, %4 : vector<16x256xf32>
    %cst_5 = arith.constant 0.000000e+00 : f32
    %6 = vector.broadcast %cst_5 : f32 to vector<16x256xf32>
    %7 = arith.cmpf ogt, %5, %6 : vector<16x256xf32>
    %cst_6 = arith.constant 0.00999999977 : f32
    %8 = vector.broadcast %cst_6 : f32 to vector<16x256xf32>
    %9 = arith.mulf %8, %5 : vector<16x256xf32>
    %10 = arith.select %7, %5, %9 : vector<16x256xi1>, vector<16x256xf32>
    %11 = arith.truncf %10 : vector<16x256xf32> to vector<16x256xbf16>
    %c0_7 = arith.constant 0 : index
    %c0_8 = arith.constant 0 : index
    %12 = vector.load %arg4[%c0_7, %c0_8] : memref<256x512xbf16, #tpu.memory_space<vmem>>, vector<256x512xbf16>
    %cst_9 = arith.constant dense<0.000000e+00> : vector<16x512xf32>
    %13 = tpu.matmul %11, %12, %cst_9 {dimension_numbers = #tpu.dot_dimension_numbers<[1], [0], [0], [1], [0, 0, 1, 1], [], []>} : vector<16x256xbf16>, vector<256x512xbf16>, vector<16x512xf32> -> vector<16x512xf32>
    %c0_10 = arith.constant 0 : index
    %c0_11 = arith.constant 0 : index
    %14 = vector.load %arg5[%c0_10, %c0_11] : memref<1x512xf32, #tpu.memory_space<vmem>>, vector<1x512xf32>
    %15 = vector.broadcast %14 : vector<1x512xf32> to vector<16x512xf32>
    %16 = arith.addf %13, %15 : vector<16x512xf32>
    %cst_12 = arith.constant 0.000000e+00 : f32
    %17 = vector.broadcast %cst_12 : f32 to vector<16x512xf32>
    %18 = arith.cmpf ogt, %16, %17 : vector<16x512xf32>
    %cst_13 = arith.constant 0.00999999977 : f32
    %19 = vector.broadcast %cst_13 : f32 to vector<16x512xf32>
    %20 = arith.mulf %19, %16 : vector<16x512xf32>
    %21 = arith.select %18, %16, %20 : vector<16x512xi1>, vector<16x512xf32>
    %22 = arith.truncf %21 : vector<16x512xf32> to vector<16x512xbf16>
    %c0_14 = arith.constant 0 : index
    %c0_15 = arith.constant 0 : index
    %23 = vector.load %arg6[%c0_14, %c0_15] : memref<512x256xbf16, #tpu.memory_space<vmem>>, vector<512x256xbf16>
    %cst_16 = arith.constant dense<0.000000e+00> : vector<16x256xf32>
    %24 = tpu.matmul %22, %23, %cst_16 {dimension_numbers = #tpu.dot_dimension_numbers<[1], [0], [0], [1], [0, 0, 1, 1], [], []>} : vector<16x512xbf16>, vector<512x256xbf16>, vector<16x256xf32> -> vector<16x256xf32>
    %c0_17 = arith.constant 0 : index
    %c0_18 = arith.constant 0 : index
    %25 = vector.load %arg7[%c0_17, %c0_18] : memref<1x256xf32, #tpu.memory_space<vmem>>, vector<1x256xf32>
    %26 = vector.broadcast %25 : vector<1x256xf32> to vector<16x256xf32>
    %27 = arith.addf %24, %26 : vector<16x256xf32>
    %cst_19 = arith.constant 0.000000e+00 : f32
    %28 = vector.broadcast %cst_19 : f32 to vector<16x256xf32>
    %29 = arith.cmpf ogt, %27, %28 : vector<16x256xf32>
    %cst_20 = arith.constant 0.00999999977 : f32
    %30 = vector.broadcast %cst_20 : f32 to vector<16x256xf32>
    %31 = arith.mulf %30, %27 : vector<16x256xf32>
    %32 = arith.select %29, %27, %31 : vector<16x256xi1>, vector<16x256xf32>
    %33 = arith.truncf %32 : vector<16x256xf32> to vector<16x256xbf16>
    %c0_21 = arith.constant 0 : index
    %c0_22 = arith.constant 0 : index
    %34 = vector.load %arg8[%c0_21, %c0_22] : memref<256x256xbf16, #tpu.memory_space<vmem>>, vector<256x256xbf16>
    %cst_23 = arith.constant dense<0.000000e+00> : vector<16x256xf32>
    %35 = tpu.matmul %33, %34, %cst_23 {dimension_numbers = #tpu.dot_dimension_numbers<[1], [0], [0], [1], [0, 0, 1, 1], [], []>} : vector<16x256xbf16>, vector<256x256xbf16>, vector<16x256xf32> -> vector<16x256xf32>
    %c0_24 = arith.constant 0 : index
    %c0_25 = arith.constant 0 : index
    %36 = vector.load %arg9[%c0_24, %c0_25] : memref<1x256xf32, #tpu.memory_space<vmem>>, vector<1x256xf32>
    %37 = vector.broadcast %36 : vector<1x256xf32> to vector<16x256xf32>
    %38 = arith.addf %35, %37 : vector<16x256xf32>
    %cst_26 = arith.constant 0.000000e+00 : f32
    %39 = vector.broadcast %cst_26 : f32 to vector<16x256xf32>
    %40 = arith.cmpf ogt, %38, %39 : vector<16x256xf32>
    %cst_27 = arith.constant 0.00999999977 : f32
    %41 = vector.broadcast %cst_27 : f32 to vector<16x256xf32>
    %42 = arith.mulf %41, %38 : vector<16x256xf32>
    %43 = arith.select %40, %38, %42 : vector<16x256xi1>, vector<16x256xf32>
    %44 = arith.truncf %43 : vector<16x256xf32> to vector<16x256xbf16>
    %c0_28 = arith.constant 0 : index
    %c0_29 = arith.constant 0 : index
    %45 = vector.load %arg10[%c0_28, %c0_29] : memref<256x128xbf16, #tpu.memory_space<vmem>>, vector<256x128xbf16>
    %cst_30 = arith.constant dense<0.000000e+00> : vector<16x128xf32>
    %46 = tpu.matmul %44, %45, %cst_30 {dimension_numbers = #tpu.dot_dimension_numbers<[1], [0], [0], [1], [0, 0, 1, 1], [], []>} : vector<16x256xbf16>, vector<256x128xbf16>, vector<16x128xf32> -> vector<16x128xf32>
    %c0_31 = arith.constant 0 : index
    %c0_32 = arith.constant 0 : index
    %47 = vector.load %arg11[%c0_31, %c0_32] : memref<1x128xf32, #tpu.memory_space<vmem>>, vector<1x128xf32>
    %48 = vector.broadcast %47 : vector<1x128xf32> to vector<16x128xf32>
    %49 = arith.addf %46, %48 : vector<16x128xf32>
    %cst_33 = arith.constant 0.000000e+00 : f32
    %50 = vector.broadcast %cst_33 : f32 to vector<16x128xf32>
    %51 = arith.cmpf ogt, %49, %50 : vector<16x128xf32>
    %cst_34 = arith.constant 0.00999999977 : f32
    %52 = vector.broadcast %cst_34 : f32 to vector<16x128xf32>
    %53 = arith.mulf %52, %49 : vector<16x128xf32>
    %54 = arith.select %51, %49, %53 : vector<16x128xi1>, vector<16x128xf32>
    %55 = arith.truncf %54 : vector<16x128xf32> to vector<16x128xbf16>
    %c0_35 = arith.constant 0 : index
    %c0_36 = arith.constant 0 : index
    %56 = vector.load %arg12[%c0_35, %c0_36] : memref<128x128xbf16, #tpu.memory_space<vmem>>, vector<128x128xbf16>
    %cst_37 = arith.constant dense<0.000000e+00> : vector<16x128xf32>
    %57 = tpu.matmul %55, %56, %cst_37 {dimension_numbers = #tpu.dot_dimension_numbers<[1], [0], [0], [1], [0, 0, 1, 1], [], []>} : vector<16x128xbf16>, vector<128x128xbf16>, vector<16x128xf32> -> vector<16x128xf32>
    %c0_38 = arith.constant 0 : index
    %c0_39 = arith.constant 0 : index
    %58 = vector.load %arg13[%c0_38, %c0_39] : memref<1x128xf32, #tpu.memory_space<vmem>>, vector<1x128xf32>
    %59 = vector.broadcast %58 : vector<1x128xf32> to vector<16x128xf32>
    %60 = arith.addf %57, %59 : vector<16x128xf32>
    %61 = vector.extract_strided_slice %60 {offsets = [0, 0], sizes = [16, 4], strides = [1, 1]} : vector<16x128xf32> to vector<16x4xf32>
    %62 = vector.extract_strided_slice %60 {offsets = [0, 4], sizes = [16, 1], strides = [1, 1]} : vector<16x128xf32> to vector<16x1xf32>
    %cst_40 = arith.constant dense<0.000000e+00> : vector<16xf32>
    %63 = vector.multi_reduction <add>, %61, %cst_40 [1] : vector<16x4xf32> to vector<16xf32>
    %64 = vector.shape_cast %63 : vector<16xf32> to vector<16x1xf32>
    %cst_41 = arith.constant 4.000000e+00 : f32
    %65 = vector.broadcast %cst_41 : f32 to vector<16x1xf32>
    %66 = arith.divf %64, %65 : vector<16x1xf32>
    %67 = vector.broadcast %66 : vector<16x1xf32> to vector<16x4xf32>
    %68 = arith.subf %61, %67 : vector<16x4xf32>
    %69 = arith.mulf %68, %68 : vector<16x4xf32>
    %cst_42 = arith.constant dense<0.000000e+00> : vector<16xf32>
    %70 = vector.multi_reduction <add>, %69, %cst_42 [1] : vector<16x4xf32> to vector<16xf32>
    %71 = vector.shape_cast %70 : vector<16xf32> to vector<16x1xf32>
    %cst_43 = arith.constant 0.333333343 : f32
    %72 = vector.broadcast %cst_43 : f32 to vector<16x1xf32>
    %73 = arith.mulf %71, %72 : vector<16x1xf32>
    %74 = math.sqrt %73 : vector<16x1xf32>
    %cst_44 = arith.constant 9.99999997E-7 : f32
    %75 = vector.broadcast %cst_44 : f32 to vector<16x1xf32>
    %76 = arith.addf %74, %75 : vector<16x1xf32>
    %77 = tpu.reciprocal %76 : vector<16x1xf32> -> vector<16x1xf32>
    %78 = vector.broadcast %66 : vector<16x1xf32> to vector<16x128xf32>
    %79 = arith.subf %60, %78 : vector<16x128xf32>
    %80 = vector.broadcast %77 : vector<16x1xf32> to vector<16x128xf32>
    %81 = arith.mulf %79, %80 : vector<16x128xf32>
    %82 = vector.broadcast %62 : vector<16x1xf32> to vector<16x128xf32>
    %83 = arith.addf %82, %81 : vector<16x128xf32>
    %c0_45 = arith.constant 0 : index
    %c0_46 = arith.constant 0 : index
    %84 = vector.load %arg14[%c0_45, %c0_46] : memref<16x128xf32, #tpu.memory_space<vmem>>, vector<16x128xf32>
    tpu.vector_store %arg14[%c0_45, %c0_46], %83 {strides = array<i32>} : memref<16x128xf32, #tpu.memory_space<vmem>>, vector<16x128xf32>,
    return
  }
  func.func @transform_0(%arg0: i32) -> (i32, i32) {
    %c0_i32 = arith.constant 0 : i32
    %c0_i32_0 = arith.constant 0 : i32
    return %arg0, %c0_i32 : i32, i32
  }
  func.func @transform_1(%arg0: i32) -> (i32, i32) {
    %c0_i32 = arith.constant 0 : i32
    %c0_i32_0 = arith.constant 0 : i32
    %c0_i32_1 = arith.constant 0 : i32
    return %c0_i32, %c0_i32_0 : i32, i32
  }
  func.func @transform_2(%arg0: i32) -> (i32, i32) {
    %c0_i32 = arith.constant 0 : i32
    %c0_i32_0 = arith.constant 0 : i32
    %c0_i32_1 = arith.constant 0 : i32
    return %c0_i32, %c0_i32_0 : i32, i32
  }
  func.func @transform_3(%arg0: i32) -> (i32, i32) {
    %c0_i32 = arith.constant 0 : i32
    %c0_i32_0 = arith.constant 0 : i32
    %c0_i32_1 = arith.constant 0 : i32
    return %c0_i32, %c0_i32_0 : i32, i32
  }
  func.func @transform_4(%arg0: i32) -> (i32, i32) {
    %c0_i32 = arith.constant 0 : i32
    %c0_i32_0 = arith.constant 0 : i32
    %c0_i32_1 = arith.constant 0 : i32
    return %c0_i32, %c0_i32_0 : i32, i32
  }
  func.func @transform_5(%arg0: i32) -> (i32, i32) {
    %c0_i32 = arith.constant 0 : i32
    %c0_i32_0 = arith.constant 0 : i32
    %c0_i32_1 = arith.constant 0 : i32
    return %c0_i32, %c0_i32_0 : i32, i32
  }
  func.func @transform_6(%arg0: i32) -> (i32, i32) {
    %c0_i32 = arith.constant 0 : i32
    %c0_i32_0 = arith.constant 0 : i32
    %c0_i32_1 = arith.constant 0 : i32
    return %c0_i32, %c0_i32_0 : i32, i32
  }
  func.func @transform_7(%arg0: i32) -> (i32, i32) {
    %c0_i32 = arith.constant 0 : i32
    %c0_i32_0 = arith.constant 0 : i32
    %c0_i32_1 = arith.constant 0 : i32
    return %c0_i32, %c0_i32_0 : i32, i32
  }
  func.func @transform_8(%arg0: i32) -> (i32, i32) {
    %c0_i32 = arith.constant 0 : i32
    %c0_i32_0 = arith.constant 0 : i32
    %c0_i32_1 = arith.constant 0 : i32
    return %c0_i32, %c0_i32_0 : i32, i32
  }
  func.func @transform_9(%arg0: i32) -> (i32, i32) {
    %c0_i32 = arith.constant 0 : i32
    %c0_i32_0 = arith.constant 0 : i32
    %c0_i32_1 = arith.constant 0 : i32
    return %c0_i32, %c0_i32_0 : i32, i32
  }
  func.func @transform_10(%arg0: i32) -> (i32, i32) {
    %c0_i32 = arith.constant 0 : i32
    %c0_i32_0 = arith.constant 0 : i32
    %c0_i32_1 = arith.constant 0 : i32
    return %c0_i32, %c0_i32_0 : i32, i32
  }
  func.func @transform_11(%arg0: i32) -> (i32, i32) {
    %c0_i32 = arith.constant 0 : i32
    %c0_i32_0 = arith.constant 0 : i32
    %c0_i32_1 = arith.constant 0 : i32
    return %c0_i32, %c0_i32_0 : i32, i32
  }
  func.func @transform_12(%arg0: i32) -> (i32, i32) {
    %c0_i32 = arith.constant 0 : i32
    %c0_i32_0 = arith.constant 0 : i32
    %c0_i32_1 = arith.constant 0 : i32
    return %c0_i32, %c0_i32_0 : i32, i32
  }
  func.func @transform_13(%arg0: i32) -> (i32, i32) {
    %c0_i32 = arith.constant 0 : i32
    %c0_i32_0 = arith.constant 0 : i32
    return %arg0, %c0_i32 : i32, i32
  }
}

</mosaic_0001>

<bundles_post_ra>
// kernel: tpu_custom_call.1
= control target key start
LH: loop header
LB: loop body
LE: loop exit
PB: predicated region body
PF: predicated region fallthrough
CT: control target
= control target key end

     0   :  { %s3553_s0 = inlined_call_operand.vmem [shape: f32[32,8], index: 0, kind: input, shape index: {}]   ;;  %s3554_s1 = inlined_call_operand.vmem [shape: f32[8,256], index: 1, kind: input, shape index: {}]   ;;  %s3555_s2 = inlined_call_operand.vmem [shape: f32[1,256], index: 2, kind: input, shape index: {}]   ;;  %s3556_s3 = inlined_call_operand.hbm [shape: bf16[256,512], index: 3, kind: input, shape index: {}]   ;;  %s3557_s4 = inlined_call_operand.vmem [shape: f32[1,512], index: 4, kind: input, shape index: {}]   ;;  %s3558_s5 = inlined_call_operand.hbm [shape: bf16[512,256], index: 5, kind: input, shape index: {}]   ;;  %s3559_s6 = inlined_call_operand.vmem [shape: f32[1,256], index: 6, kind: input, shape index: {}]   ;;  %s3560_s7 = inlined_call_operand.hbm [shape: bf16[256,256], index: 7, kind: input, shape index: {}]   ;;  %s3561_s8 = inlined_call_operand.vmem [shape: f32[1,256], index: 8, kind: input, shape index: {}]   ;;  %s3562_s9 = inlined_call_operand.hbm [shape: bf16[256,128], index: 9, kind: input, shape index: {}]   ;;  %s3563_s10 = inlined_call_operand.vmem [shape: f32[1,128], index: 10, kind: input, shape index: {}]   ;;  %s3564_s11 = inlined_call_operand.hbm [shape: bf16[128,128], index: 11, kind: input, shape index: {}]   ;;  %s3565_s12 = inlined_call_operand.vmem [shape: f32[1,128], index: 12, kind: input, shape index: {}]   ;;  %s3566_s13 = inlined_call_operand.hbm [shape: f32[32,128], index: 13, kind: output, shape index: {}]  }
   0x1   :  { %3576 = sst [smem:[#allocation20_spill]] %s3558_s5 }
   0x2   :  { %3577 = sst [smem:[#allocation21_spill]] %s3562_s9 }
   0x3   :  { %18 = vsyncpa [#allocation3], 0 }
   0x4   :  { %19 = vsyncpa [#allocation6], 0 }
   0x5   :  { %20 = vsyncpa [#allocation9], 0 }
   0x6   :  { %21 = vsyncpa [#allocation4], 0 }
   0x7   :  { %23 = vsyncpa [#allocation4 + $0x1], 0  ;;  %s3312_s25 = smov 0   ;;  %s3314_s26 = smov 0  }
   0x8   :  { %s3316_s27 = smov 0   ;;  %s3318_s28 = smov 0  }
   0x9 LB: > { %3578 = sst [smem:[#allocation16_spill]] %s3219_s27  ;;  %s3333_s29 = sadd.s32 4294967295, %s3223_s28   ;;  %s3223_s28 = sphi %s3318_s28, %s3600_s28   ;;  %s3219_s27 = sphi %s3316_s27, %s3602_s27   ;;  %s3215_s26 = sphi %s3314_s26, %s3604_s26   ;;  %s3211_s25 = sphi %s3312_s25, %s3603_s25  }
   0xa   : > { %s2384_s30 = sadd.s32 4294967294, %s3223_s28   ;;  %s3337_s14 = sadd.s32 1, %s3223_s28  }
   0xb   : > { %3579 = sst [smem:[#allocation17_spill]] %s3337_s14  ;;  %s314_s15 = sadd.s32 1, %s3219_s27 }
   0xc   : > { %s311_s16 = ssub.s32 %s3223_s28, %s3337_s14  ;;  %p324_p0 = scmp.ne.s32.totalorder %s3219_s27, %s3215_s26 }
   0xd   : > { %p312_p1 = scmp.eq.s32.totalorder %s311_s16, 0  ;;  %p325_p2 = scmp.eq.s32.totalorder %s3333_s29, 1 }
   0xe   : > { %p330_p3 = scmp.ne.s32.totalorder %s3215_s26, %s3211_s25  ;;  %p331_p4 = scmp.eq.s32.totalorder %s2384_s30, 1 }
   0xf   : > { %s3348_s17 = scalar_select %p312_p1, %s3219_s27, %s314_s15  }
  0x10   : > { %p3350_p5 = por %p325_p2, %p324_p0  ;;  %p3354_p6 = por %p331_p4, %p330_p3 }
  0x11   : > { %3580 = sst [smem:[#allocation18_spill]] %s3348_s17  ;;  %p2385_p7 = scmp.ge.s32.totalorder %s3223_s28, 1 }
  0x12   : > { %s3582_s19 = scalar_select %p3354_p6, 1, 0 }
  0x13   : > { %p338_p8 = scmp.lt.s32.totalorder %s3223_s28, 3  ;;  %p3575_p9 = scmp.eq.s32.totalorder %s3333_s29, 0 }
  0x14   : > { %3583 = sst [smem:[#allocation19_spill]] %s3582_s19  ;;  %s3225_s21 = smov [#allocation5]  }
  0x15   : > { %p3361_p10 = pnand %p2385_p7, %p338_p8  ;;  %s372_s22 = sshll.u32 %s3225_s21, 4  ;;  %s373_s22 = int_to_ptr.vmem [resolvable:$true] %s372_s22 }
  0x16   : > { %s3226_s24 = smov [#allocation8]   ;;  %s3032_s16 = scalar_lea.vmem %s373_s22, 8192 }
  0x17   : > { %p2668_p11 = pneg %p3361_p10  ;;  %s404_s30 = sshll.u32 %s3226_s24, 4  ;;  %s405_s30 = int_to_ptr.vmem [resolvable:$true] %s404_s30 }
  0x18   : > { %p3033_p0 = scmp.ne.s32.totalorder %s373_s22, %s3032_s16  ;;  %p3040_p3 = scmp.lt.s32.totalorder %s373_s22, %s373_s22 }
  0x19   : > { %p3369_p12 = pnand %p3575_p9, %p2668_p11  ;;  %p3041_p4 = scmp.lt.s32.totalorder %s3032_s16, %s3032_s16 }
  0x1b   : > { %p3375_p13 = pneg %p3369_p12  ;;  %p3042_p7 = por %p3041_p4, %p3040_p3 }
  0x1d   : > { %p3035_p1 = pnand %p3033_p0, %p3375_p13 }
  0x1f   : > { %p3036_p2 = pneg %p3035_p1 }
  0x21   : > { %p3043_p8 = pnand %p3042_p7, %p3036_p2 }
  0x23   : > { %3046 = shalt.err (!%p3043_p8)
}
  0x24   : > { %s3571_s21 = smov 128   ;;  %s3572_s24 = smov 8  }
  0x25   : > { %s3587_s5 = sld [smem:[#allocation20_spill]]  ;;  %s3058_s14 = scalar_lea.vmem %s405_s30, 2048 }
  0x26   : > { %p3059_p11 = scmp.ne.s32.totalorder %s405_s30, %s3058_s14  ;;  %p3066_p3 = scmp.lt.s32.totalorder %s405_s30, %s405_s30 }
  0x27   : > { %p3067_p2 = scmp.lt.s32.totalorder %s3058_s14, %s3058_s14 }
  0x28   : > { %p3061_p0 = pnand %p3059_p11, %p3375_p13 }
  0x29   : > { %p3068_p4 = por %p3067_p2, %p3066_p3 }
  0x2a   : > { %p3062_p1 = pneg %p3061_p0 }
  0x2b   : > { %2674 = dma.hbm_to_vmem [thread:$0]  (!%p3369_p12), %s3587_s5, 8192, %s373_s22, [#allocation6], %s3571_s21, %s3571_s21, %s3572_s24  }
  0x2c   : > { %p3069_p7 = pnand %p3068_p4, %p3062_p1 }
  0x2e   : > { %3072 = shalt.err (!%p3069_p7)
}
  0x2f   : > { %s3573_s16 = smov 64   ;;  %s3574_s19 = smov 4  }
  0x30   : > { %s3588_s9 = sld [smem:[#allocation21_spill]]  ;;  %s3231_s22 = smov [#allocation2]  }
  0x31   : > { %s356_s21 = sshll.u32 %s3231_s22, 4  ;;  %s357_s21 = int_to_ptr.vmem [resolvable:$true] %s356_s21 }
  0x32   : > { %s3084_s24 = scalar_lea.vmem %s357_s21, 8192  ;;  %p3092_p1 = scmp.lt.s32.totalorder %s357_s21, %s357_s21 }
  0x33   : > { %p3085_p8 = scmp.ne.s32.totalorder %s357_s21, %s3084_s24  ;;  %p3093_p3 = scmp.lt.s32.totalorder %s3084_s24, %s3084_s24 }
  0x35   : > { %p3087_p11 = pnand %p3085_p8, %p3375_p13  ;;  %p3094_p2 = por %p3093_p3, %p3092_p1 }
  0x36   : > { %2680 = dma.hbm_to_vmem [thread:$0]  (!%p3369_p12), %s3588_s9, 2048, %s405_s30, [#allocation9], %s3573_s16, %s3573_s16, %s3574_s19  }
  0x37   : > { %p3088_p0 = pneg %p3087_p11 }
  0x39   : > { %p3095_p4 = pnand %p3094_p2, %p3088_p0 }
  0x3b   : > { %3098 = shalt.err (!%p3095_p4)
}
  0x3c   : > { %s3232_s14 = smov 256   ;;  %s3233_s5 = smov 16  }
  0x3d   : > { %2671 = dma.hbm_to_vmem [thread:$0]  (!%p3369_p12), %s3556_s3, 8192, %s357_s21, [#allocation3], %s3232_s14, %s3232_s14, %s3233_s5  }
  0x3e   : > { %s3234_s17 = smov [#allocation7]   ;;  %s3235_s16 = smov [#allocation10]  }
  0x3f   : > { %s388_s22 = sshll.u32 %s3234_s17, 4  ;;  %s420_s19 = sshll.u32 %s3235_s16, 4  ;;  %s389_s22 = int_to_ptr.vmem [resolvable:$true] %s388_s22  ;;  %s421_s19 = int_to_ptr.vmem [resolvable:$true] %s420_s19 }
  0x40   : > { %s3110_s9 = scalar_lea.vmem %s389_s22, 4096  ;;  %p3118_p0 = scmp.lt.s32.totalorder %s389_s22, %s389_s22 }
  0x41   : > { %p3111_p7 = scmp.ne.s32.totalorder %s389_s22, %s3110_s9  ;;  %p3119_p1 = scmp.lt.s32.totalorder %s3110_s9, %s3110_s9 }
  0x43   : > { %p3113_p8 = pnand %p3111_p7, %p3375_p13  ;;  %p3120_p3 = por %p3119_p1, %p3118_p0 }
  0x45   : > { %p3114_p11 = pneg %p3113_p8 }
  0x47   : > { %p3121_p2 = pnand %p3120_p3, %p3114_p11 }
  0x49   : > { %3124 = shalt.err (!%p3121_p2)
}
  0x4a   : > { %s3589_s24 = smov 8   ;;  %s3590_s27 = smov 128  }
  0x4b   : > { %2677 = dma.hbm_to_vmem [thread:$0]  (!%p3369_p12), %s3560_s7, 4096, %s389_s22, [#allocation6], %s3590_s27, %s3590_s27, %s3589_s24  }
  0x4c   : > { %s3136_s16 = scalar_lea.vmem %s421_s19, 1024  ;;  %p3144_p9 = scmp.lt.s32.totalorder %s421_s19, %s421_s19 }
  0x4d   : > { %p3137_p4 = scmp.ne.s32.totalorder %s421_s19, %s3136_s16  ;;  %p3145_p0 = scmp.lt.s32.totalorder %s3136_s16, %s3136_s16 }
  0x4f   : > { %p3139_p7 = pnand %p3137_p4, %p3375_p13  ;;  %p3146_p11 = por %p3145_p0, %p3144_p9 }
  0x51   : > { %p3140_p8 = pneg %p3139_p7 }
  0x53   : > { %p3147_p1 = pnand %p3146_p11, %p3140_p8 }
  0x55   : > { %3150 = shalt.err (!%p3147_p1)
}
  0x56   : > { %s3591_s9 = smov 4   ;;  %s3592_s14 = smov 64  }
  0x57   : > { %2683 = dma.hbm_to_vmem [thread:$0]  (!%p3369_p12), %s3564_s11, 1024, %s421_s19, [#allocation9], %s3592_s14, %s3592_s14, %s3591_s9  }
  0x58   : > { %448 = sbr.rel (%p3361_p10) target bundleno = 1683 (0x693), region = 72  ;;  %p3593_p13 = scmp.eq.s32.totalorder (!%p3361_p10), %s3333_s29, 0 }
  0x5d   : > { %3194 = dma.done.wait (%p3593_p13), [#allocation3], 8192   ;;  %p3594_p3 = pmov %p3593_p13 }
  0x5f   : > { %3196 = vsyncadd (%p3594_p3), [#allocation3], 4294959104  ;;  %p3595_p9 = pmov %p3594_p3 }
  0x60   : > { %p3596_p2 = pmov %p3594_p3 }
  0x61   : > { %3198 = dma.done.wait (%p3595_p9), [#allocation6], 12288  }
  0x62   : > { %3200 = vsyncadd (%p3596_p2), [#allocation6], 4294955008  ;;  %p3597_p4 = pmov %p3596_p2 }
  0x63   : > { %p3598_p12 = pmov %p3596_p2 }
  0x64   : > { %3202 = dma.done.wait (%p3597_p4), [#allocation9], 3072  }
  0x65   : > { %3204 = vsyncadd (%p3598_p12), [#allocation9], 4294964224  ;;  %s2399_s19 = sshll.u32 %s3333_s29, 1  ;;  %v3236_v0 = vmov 0.0   ;;  %v519_v1 = vld [vmem:[%s3554_s1 + $0x8] sm:$0xff]  ;;  %v518_v2 = vld [vmem:[%s3554_s1] sm:$0xff] }
  0x66   : > { %603 = vmatprep.mubr.f32.mxu0 %v3236_v0  ;;  %p509_p10 = scmp.lt.s32.totalorder %s2399_s19, 3  ;;  %vm532_vm0 = vcmask 64512   ;;  %569 = vmatprep.subr.mxu0 %v519_v1  ;;  %v2749_v5 = vld [vmem:[#allocation2 + $0xe4] ss:$16 sps:$4 sm:$0xff]   ;;  %v2751_v6 = vld [vmem:[#allocation2 + $0xe8] ss:$16 sps:$4 sm:$0xff]  }
  0x67   : > { %570 = vmatpush1.msra.mxu0 %v518_v2  ;;  %v2753_v7 = vld [vmem:[#allocation2 + $0xec] ss:$16 sps:$4 sm:$0xff]   ;;  %v2754_v8 = vld [vmem:[#allocation2 + $0xe0] ss:$16 sps:$4 sm:$0xff]   ;;  %1036 = vmatprep.subr.bf16.mxu1 %v2749_v5  ;;  %v2755_v9 = vld [vmem:[#allocation2 + $0xc4] ss:$16 sps:$4 sm:$0xff]  }
  0x68   : > { %s3606_s19 = smov (!%p509_p10, %s2399_s19), 3  ;;  %1079 = vmatprep.subr.bf16.mxu0 %v2753_v7  ;;  %1037 = vmatpush1.bf16.msra.mxu1 %v2754_v8  ;;  %v2757_v10 = vld [vmem:[#allocation2 + $0xc8] ss:$16 sps:$4 sm:$0xff]   ;;  %v2759_v11 = vld [vmem:[#allocation2 + $0xcc] ss:$16 sps:$4 sm:$0xff]   ;;  %v522_v8 = vlaneseq  ;;  %s505_s5 = sand.u32 1, %s3215_s26  }
  0x69   : > { %s2400_s20 = sshll.u32 %s3606_s19, 3  ;;  %1038 = vmatprep.subr.bf16.mxu1 %v2755_v9  ;;  %v2760_v12 = vld [vmem:[#allocation2 + $0xc0] ss:$16 sps:$4 sm:$0xff]   ;;  %v2761_v13 = vld [vmem:[#allocation2 + $0xa4] ss:$16 sps:$4 sm:$0xff]   ;;  %s2398_s21 = sshll.u32 %s505_s5, 4 }
  0x6a   : > { %s512_s22 = scalar_lea.vmem %s3553_s0, %s2400_s20  ;;  %v2763_v14 = vld [vmem:[#allocation2 + $0xa8] ss:$16 sps:$4 sm:$0xff]   ;;  %v2765_v15 = vld [vmem:[#allocation2 + $0xac] ss:$16 sps:$4 sm:$0xff]   ;;  %v2766_v16 = vld [vmem:[#allocation2 + $0xa0] ss:$16 sps:$4 sm:$0xff]  }
  0x6b   : > { %v516_v3 = vld [vmem:[%s512_s22] sm:$0xff]  ;;  %v517_v4 = vld [vmem:[%s512_s22 + $0x8] sm:$0xff]  ;;  %v2850_v7 = vld [vmem:[#allocation5 + $0x174] ss:$8 sps:$4 sm:$0xff]   ;;  %v3454_v9 = vshrl.u32 %v522_v8, 7  ;;  %s507_s16 = scalar_lea.vmem [#allocation11], %s2398_s21 }
  0x6c   : > { %2401 = vmatmul.mubr.msk.f32.vlgmr.msra.gmra.mxu0 %vm532_vm0, %v516_v3  ;;  %1039 = vmatpush1.bf16.msra.mxu1 %v2760_v12  ;;  %v2767_v17 = vld [vmem:[#allocation2 + $0x84] ss:$16 sps:$4 sm:$0xff]   ;;  %v2771_v18 = vld [vmem:[#allocation2 + $0x8c] ss:$16 sps:$4 sm:$0xff]   ;;  %v2772_v19 = vld [vmem:[#allocation2 + $0x80] ss:$16 sps:$4 sm:$0xff]  }
  0x6d   : > { %609 = vmatprep.mubr.f32.mxu0 %v3236_v0  ;;  %1080 = vmatpush1.bf16.msra.mxu0 %v2751_v6  ;;  %v2769_v20 = vld [vmem:[#allocation2 + $0x88] ss:$16 sps:$4 sm:$0xff]   ;;  %v2773_v21 = vld [vmem:[#allocation2 + $0x64] ss:$16 sps:$4 sm:$0xff]   ;;  %v2777_v22 = vld [vmem:[#allocation2 + $0x6c] ss:$16 sps:$4 sm:$0xff]  }
  0x6e   : > { %1081 = vmatprep.subr.bf16.mxu0 %v2759_v11  ;;  %1040 = vmatprep.subr.bf16.mxu1 %v2761_v13  ;;  %v2775_v23 = vld [vmem:[#allocation2 + $0x68] ss:$16 sps:$4 sm:$0xff]   ;;  %v2778_v24 = vld [vmem:[#allocation2 + $0x60] ss:$16 sps:$4 sm:$0xff]   ;;  %v2779_v25 = vld [vmem:[#allocation2 + $0x44] ss:$16 sps:$4 sm:$0xff]  }
  0x6f   : > { %v2783_v26 = vld [vmem:[#allocation2 + $0x4c] ss:$16 sps:$4 sm:$0xff]   ;;  %v2784_v27 = vld [vmem:[#allocation2 + $0x40] ss:$16 sps:$4 sm:$0xff]   ;;  %v2781_v28 = vld [vmem:[#allocation2 + $0x48] ss:$16 sps:$4 sm:$0xff]  }
  0x70   : > { %2402 = vmatmul.mubr.msk.f32.gmra.mxu0 %vm532_vm0, %v517_v4  ;;  %1041 = vmatpush1.bf16.msra.mxu1 %v2766_v16  ;;  %v2785_v29 = vld [vmem:[#allocation2 + $0x24] ss:$16 sps:$4 sm:$0xff]   ;;  %v2789_v30 = vld [vmem:[#allocation2 + $0x2c] ss:$16 sps:$4 sm:$0xff]   ;;  %v2787_v31 = vld [vmem:[#allocation2 + $0x28] ss:$16 sps:$4 sm:$0xff]  }
  0x71   : > { %1082 = vmatpush1.bf16.msra.mxu0 %v2757_v10  ;;  %1042 = vmatprep.subr.bf16.mxu1 %v2767_v17  ;;  %v2790_v32 = vld [vmem:[#allocation2 + $0x20] ss:$16 sps:$4 sm:$0xff]   ;;  %v2791_v33 = vld [vmem:[#allocation2 + $0x4] ss:$16 sps:$4 sm:$0xff]   ;;  %v2795_v34 = vld [vmem:[#allocation2 + $0xc] ss:$16 sps:$4 sm:$0xff]  }
  0x72   : > { %1083 = vmatprep.subr.bf16.mxu0 %v2765_v15  ;;  %v2796_v35 = vld [vmem:[#allocation2] ss:$16 sps:$4 sm:$0xff]   ;;  %v2793_v36 = vld [vmem:[#allocation2 + $0x8] ss:$16 sps:$4 sm:$0xff]   ;;  %v2797_v37 = vld [vmem:[#allocation2 + $0x1e4] ss:$16 sps:$4 sm:$0xff]  }
  0x73   : > { %v2801_v38 = vld [vmem:[#allocation2 + $0x1ec] ss:$16 sps:$4 sm:$0xff]   ;;  %v2799_v39 = vld [vmem:[#allocation2 + $0x1e8] ss:$16 sps:$4 sm:$0xff]   ;;  %v2802_v40 = vld [vmem:[#allocation2 + $0x1e0] ss:$16 sps:$4 sm:$0xff]  }
  0x74   : > { %1043 = vmatpush1.bf16.msra.mxu1 %v2772_v19  ;;  %v2803_v41 = vld [vmem:[#allocation2 + $0x1c4] ss:$16 sps:$4 sm:$0xff]   ;;  %v2807_v42 = vld [vmem:[#allocation2 + $0x1cc] ss:$16 sps:$4 sm:$0xff]   ;;  %v2808_v43 = vld [vmem:[#allocation2 + $0x1c0] ss:$16 sps:$4 sm:$0xff]  }
  0x75   : > { %1084 = vmatpush1.bf16.msra.mxu0 %v2763_v14  ;;  %1044 = vmatprep.subr.bf16.mxu1 %v2773_v21  ;;  %v2805_v44 = vld [vmem:[#allocation2 + $0x1c8] ss:$16 sps:$4 sm:$0xff]   ;;  %v2809_v45 = vld [vmem:[#allocation2 + $0x1a4] ss:$16 sps:$4 sm:$0xff]   ;;  %v2813_v46 = vld [vmem:[#allocation2 + $0x1ac] ss:$16 sps:$4 sm:$0xff]  }
  0x76   : > { %1085 = vmatprep.subr.bf16.mxu0 %v2771_v18  ;;  %v2814_v47 = vld [vmem:[#allocation2 + $0x1a0] ss:$16 sps:$4 sm:$0xff]   ;;  %v2811_v48 = vld [vmem:[#allocation2 + $0x1a8] ss:$16 sps:$4 sm:$0xff]   ;;  %v2815_v49 = vld [vmem:[#allocation2 + $0x184] ss:$16 sps:$4 sm:$0xff]  }
  0x77   : > { %v2819_v50 = vld [vmem:[#allocation2 + $0x18c] ss:$16 sps:$4 sm:$0xff]   ;;  %v2820_v51 = vld [vmem:[#allocation2 + $0x180] ss:$16 sps:$4 sm:$0xff]   ;;  %v2817_v52 = vld [vmem:[#allocation2 + $0x188] ss:$16 sps:$4 sm:$0xff]  }
  0x78   : > { %1045 = vmatpush1.bf16.msra.mxu1 %v2778_v24  ;;  %v2821_v53 = vld [vmem:[#allocation2 + $0x164] ss:$16 sps:$4 sm:$0xff]   ;;  %v2825_v54 = vld [vmem:[#allocation2 + $0x16c] ss:$16 sps:$4 sm:$0xff]   ;;  %v2823_v55 = vld [vmem:[#allocation2 + $0x168] ss:$16 sps:$4 sm:$0xff]  }
  0x79   : > { %1086 = vmatpush1.bf16.msra.mxu0 %v2769_v20  ;;  %1046 = vmatprep.subr.bf16.mxu1 %v2779_v25  ;;  %v2826_v56 = vld [vmem:[#allocation2 + $0x160] ss:$16 sps:$4 sm:$0xff]   ;;  %v2827_v57 = vld [vmem:[#allocation2 + $0x144] ss:$16 sps:$4 sm:$0xff]   ;;  %v2831_v58 = vld [vmem:[#allocation2 + $0x14c] ss:$16 sps:$4 sm:$0xff]  }
  0x7a   : > { %1087 = vmatprep.subr.bf16.mxu0 %v2777_v22  ;;  %v2829_v59 = vld [vmem:[#allocation2 + $0x148] ss:$16 sps:$4 sm:$0xff]   ;;  %v2832_v60 = vld [vmem:[#allocation2 + $0x140] ss:$16 sps:$4 sm:$0xff]   ;;  %v2833_v61 = vld [vmem:[#allocation2 + $0x124] ss:$16 sps:$4 sm:$0xff]  }
  0x7b   : > { %v2837_v62 = vld [vmem:[#allocation2 + $0x12c] ss:$16 sps:$4 sm:$0xff]   ;;  %v2835_v63 = vld [vmem:[#allocation2 + $0x128] ss:$16 sps:$4 sm:$0xff]   ;;  %v2838_v1 = vld [vmem:[#allocation2 + $0x120] ss:$16 sps:$4 sm:$0xff]  }
  0x7c   : > { %1047 = vmatpush1.bf16.msra.mxu1 %v2784_v27  ;;  %v2839_v2 = vld [vmem:[#allocation2 + $0x104] ss:$16 sps:$4 sm:$0xff]   ;;  %v2841_v3 = vld [vmem:[#allocation2 + $0x108] ss:$16 sps:$4 sm:$0xff]   ;;  %v2843_v4 = vld [vmem:[#allocation2 + $0x10c] ss:$16 sps:$4 sm:$0xff]  }
  0x7d   : > { %1088 = vmatpush1.bf16.msra.mxu0 %v2775_v23  ;;  %1048 = vmatprep.subr.bf16.mxu1 %v2785_v29  ;;  %v2844_v5 = vld [vmem:[#allocation2 + $0x100] ss:$16 sps:$4 sm:$0xff]   ;;  %v2847_v6 = vld [vmem:[#allocation5 + $0x74] ss:$8 sps:$4 sm:$0xff]   ;;  %v3457_v10 = vsub.s32 1, %v3454_v9  ;;  %v3460_v11 = vsub.s32 0, %v3454_v9 }
  0x7e   : > { %1089 = vmatprep.subr.bf16.mxu0 %v2783_v26  ;;  %v520_v12 = vld [vmem:[%s3555_s2] sm:$0x3]  ;;  %v2907_v8 = vld [vmem:[#allocation5 + $0xd4] ss:$8 sps:$4 sm:$0xff]   ;;  %s2272_s9 = sshll.u32 %s507_s16, 4  ;;  %s2594_s14 = sshll.u32 %s3333_s29, 8  ;;  %s3506_s9 = int_to_ptr.vmem [resolvable:$true] %s2272_s9 }
  0x7f   : > { %v529_v13 = vrot.slane %v520_v12, %v3457_v10  ;;  %v525_v14 = vrot.slane %v520_v12, %v3460_v11  ;;  %v2910_v12 = vld [vmem:[#allocation5 + $0x1d4] ss:$8 sps:$4 sm:$0xff]   ;;  %s3511_s19 = scalar_lea.hbm %s3566_s13, %s2594_s14  ;;  %s3513_s20 = scalar_lea.sflag [#allocation4], %s505_s5 }
  0x80   : > { %1049 = vmatpush1.bf16.msra.mxu1 %v2790_v32  ;;  %v2845_v32 = vld [vmem:[#allocation5 + $0x70] ss:$8 sps:$4 sm:$0xff]   ;;  %s3151_s23 = scalar_lea.vmem %s3506_s9, 256  ;;  %s3239_s29 = smov [#allocation11]  }
  0x81   : > { %1090 = vmatpush1.bf16.msra.mxu0 %v2781_v28  ;;  %1050 = vmatprep.subr.bf16.mxu1 %v2791_v33  ;;  %v2848_v33 = vld [vmem:[#allocation5 + $0x170] ss:$8 sps:$4 sm:$0xff]   ;;  %p3152_p7 = scmp.ne.s32.totalorder %s3506_s9, %s3151_s23  ;;  %s3155_s15 = sshll.u32 %s3239_s29, 4  ;;  %s3156_s15 = int_to_ptr.vmem [resolvable:$false] %s3155_s15 }
  0x82   : > { %1091 = vmatprep.subr.bf16.mxu0 %v2789_v30  ;;  %s3157_s22 = scalar_lea.vmem %s3156_s15, 512  ;;  %p3158_p11 = scmp.lt.s32.totalorder %s3506_s9, %s3156_s15 }
  0x83   : > { %p3153_p8 = pnand %p3152_p7, %p3350_p5  ;;  %p3159_p1 = scmp.lt.s32.totalorder %s3157_s22, %s3151_s23 }
  0x84   : > { %1051 = vmatpush1.bf16.msra.mxu1 %v2796_v35  ;;  %v2853_v35 = vld [vmem:[#allocation5 + $0x64] ss:$8 sps:$4 sm:$0xff]  }
  0x85   : > { %1092 = vmatpush1.bf16.msra.mxu0 %v2787_v31  ;;  %1052 = vmatprep.subr.bf16.mxu1 %v2797_v37  ;;  %v2851_v37 = vld [vmem:[#allocation5 + $0x60] ss:$8 sps:$4 sm:$0xff]   ;;  %p3154_p0 = pneg %p3153_p8  ;;  %p3160_p13 = por %p3159_p1, %p3158_p11 }
  0x86   : > { %1093 = vmatprep.subr.bf16.mxu0 %v2795_v34 }
  0x87   : > { %p3161_p3 = pnand %p3160_p13, %p3154_p0 }
  0x88   : > { %1053 = vmatpush2.bf16.msra.mxu1 %v2802_v40  ;;  %v2862_v40 = vld [vmem:[#allocation5 + $0x154] ss:$8 sps:$4 sm:$0xff]  }
  0x89   : > { %1094 = vmatpush1.bf16.msra.mxu0 %v2793_v36  ;;  %1054 = vmatprep.subr.bf16.mxu1 %v2803_v41  ;;  %v2856_v36 = vld [vmem:[#allocation5 + $0x164] ss:$8 sps:$4 sm:$0xff]   ;;  %v2857_v41 = vld [vmem:[#allocation5 + $0x50] ss:$8 sps:$4 sm:$0xff]  }
  0x8a   : > { %1095 = vmatprep.subr.bf16.mxu0 %v2801_v38  ;;  %v2854_v38 = vld [vmem:[#allocation5 + $0x160] ss:$8 sps:$4 sm:$0xff]  }
  0x8c   : > { %1055 = vmatpush2.bf16.msra.mxu1 %v2808_v43  ;;  %v2865_v43 = vld [vmem:[#allocation5 + $0x44] ss:$8 sps:$4 sm:$0xff]  }
  0x8d   : > { %1096 = vmatpush2.bf16.msra.mxu0 %v2799_v39  ;;  %1056 = vmatprep.subr.bf16.mxu1 %v2809_v45  ;;  %v2859_v39 = vld [vmem:[#allocation5 + $0x54] ss:$8 sps:$4 sm:$0xff]   ;;  %v2863_v45 = vld [vmem:[#allocation5 + $0x40] ss:$8 sps:$4 sm:$0xff]  }
  0x8e   : > { %1097 = vmatprep.subr.bf16.mxu0 %v2807_v42  ;;  %v2860_v42 = vld [vmem:[#allocation5 + $0x150] ss:$8 sps:$4 sm:$0xff]  }
  0x90   : > { %1057 = vmatpush2.bf16.msra.mxu1 %v2814_v47  ;;  %v2871_v47 = vld [vmem:[#allocation5 + $0x34] ss:$8 sps:$4 sm:$0xff]  }
  0x91   : > { %1098 = vmatpush2.bf16.msra.mxu0 %v2805_v44  ;;  %1058 = vmatprep.subr.bf16.mxu1 %v2815_v49  ;;  %v2868_v44 = vld [vmem:[#allocation5 + $0x144] ss:$8 sps:$4 sm:$0xff]   ;;  %v2869_v49 = vld [vmem:[#allocation5 + $0x30] ss:$8 sps:$4 sm:$0xff]  }
  0x92   : > { %1099 = vmatprep.subr.bf16.mxu0 %v2813_v46  ;;  %v2866_v46 = vld [vmem:[#allocation5 + $0x140] ss:$8 sps:$4 sm:$0xff]  }
  0x94   : > { %1059 = vmatpush2.bf16.msra.mxu1 %v2820_v51  ;;  %v2877_v51 = vld [vmem:[#allocation5 + $0x24] ss:$8 sps:$4 sm:$0xff]  }
  0x95   : > { %1100 = vmatpush2.bf16.msra.mxu0 %v2811_v48  ;;  %1060 = vmatprep.subr.bf16.mxu1 %v2821_v53  ;;  %v2874_v48 = vld [vmem:[#allocation5 + $0x134] ss:$8 sps:$4 sm:$0xff]   ;;  %v2875_v53 = vld [vmem:[#allocation5 + $0x20] ss:$8 sps:$4 sm:$0xff]  }
  0x96   : > { %1101 = vmatprep.subr.bf16.mxu0 %v2819_v50  ;;  %v2872_v50 = vld [vmem:[#allocation5 + $0x130] ss:$8 sps:$4 sm:$0xff]  }
  0x98   : > { %1061 = vmatpush2.bf16.msra.mxu1 %v2826_v56  ;;  %v2886_v56 = vld [vmem:[#allocation5 + $0x114] ss:$8 sps:$4 sm:$0xff]  }
  0x99   : > { %1102 = vmatpush2.bf16.msra.mxu0 %v2817_v52  ;;  %1062 = vmatprep.subr.bf16.mxu1 %v2827_v57  ;;  %v2880_v52 = vld [vmem:[#allocation5 + $0x124] ss:$8 sps:$4 sm:$0xff]   ;;  %v2881_v57 = vld [vmem:[#allocation5 + $0x10] ss:$8 sps:$4 sm:$0xff]  }
  0x9a   : > { %1103 = vmatprep.subr.bf16.mxu0 %v2825_v54  ;;  %v2878_v54 = vld [vmem:[#allocation5 + $0x120] ss:$8 sps:$4 sm:$0xff]  }
  0x9c   : > { %1063 = vmatpush2.bf16.msra.mxu1 %v2832_v60  ;;  %v2892_v60 = vld [vmem:[#allocation5 + $0x104] ss:$8 sps:$4 sm:$0xff]  }
  0x9d   : > { %1104 = vmatpush2.bf16.msra.mxu0 %v2823_v55  ;;  %1064 = vmatprep.subr.bf16.mxu1 %v2833_v61  ;;  %v2883_v55 = vld [vmem:[#allocation5 + $0x14] ss:$8 sps:$4 sm:$0xff]   ;;  %v2887_v61 = vld [vmem:[#allocation5] ss:$8 sps:$4 sm:$0xff]  }
  0x9e   : > { %1105 = vmatprep.subr.bf16.mxu0 %v2831_v58  ;;  %v2884_v58 = vld [vmem:[#allocation5 + $0x110] ss:$8 sps:$4 sm:$0xff]  }
  0xa0   : > { %1065 = vmatpush2.bf16.msra.mxu1 %v2838_v1  ;;  %v2898_v1 = vld [vmem:[#allocation5 + $0x1f4] ss:$8 sps:$4 sm:$0xff]  }
  0xa1   : > { %1106 = vmatpush2.bf16.msra.mxu0 %v2829_v59  ;;  %1066 = vmatprep.subr.bf16.mxu1 %v2839_v2  ;;  %v2889_v59 = vld [vmem:[#allocation5 + $0x4] ss:$8 sps:$4 sm:$0xff]   ;;  %v2893_v2 = vld [vmem:[#allocation5 + $0xf0] ss:$8 sps:$4 sm:$0xff]  }
  0xa2   : > { %1107 = vmatprep.subr.bf16.mxu0 %v2837_v62  ;;  %v2890_v62 = vld [vmem:[#allocation5 + $0x100] ss:$8 sps:$4 sm:$0xff]  }
  0xa4   : > { %1067 = vmatpush2.bf16.msra.mxu1 %v2844_v5  ;;  %v2904_v5 = vld [vmem:[#allocation5 + $0x1e4] ss:$8 sps:$4 sm:$0xff]  }
  0xa5   : > { %1108 = vmatpush2.bf16.msra.mxu0 %v2835_v63  ;;  %1546 = vmatprep.subr.bf16.mxu1 %v2847_v6  ;;  %v2895_v63 = vld [vmem:[#allocation5 + $0xf4] ss:$8 sps:$4 sm:$0xff]   ;;  %v2899_v6 = vld [vmem:[#allocation5 + $0xe0] ss:$8 sps:$4 sm:$0xff]  }
  0xa6   : > { %1109 = vmatprep.subr.bf16.mxu0 %v2843_v4  ;;  %v2901_v4 = vld [vmem:[#allocation5 + $0xe4] ss:$8 sps:$4 sm:$0xff]  }
  0xa9   : > { %1110 = vmatpush2.bf16.msra.mxu0 %v2841_v3  ;;  %v2896_v3 = vld [vmem:[#allocation5 + $0x1f0] ss:$8 sps:$4 sm:$0xff]  }
  0xaa   : > { %1589 = vmatprep.subr.bf16.mxu0 %v2850_v7  ;;  %v2902_v7 = vld [vmem:[#allocation5 + $0x1e0] ss:$8 sps:$4 sm:$0xff]  }
 0x12c   : > { %v605_v15 = vpop.f32.mrf.mxu0 }
 0x12d   : > { %v606_v18 = vadd.f32 %v605_v15, %v525_v14  ;;  %v2913_v15 = vld [vmem:[#allocation5 + $0xc4] ss:$8 sps:$4 sm:$0xff]  }
 0x12e   : > { %v607_v16 = vpop.f32.mrf.mxu0 }
 0x12f   : > { %v608_v17 = vadd.f32 %v607_v16, %v529_v13  ;;  %v620_v25 = vmul.f32 0.01, %v606_v18  ;;  %vm616_vm3 = vcmp.gt.f32.partialorder %v606_v18, 0.0  ;;  %v2916_v16 = vld [vmem:[#allocation5 + $0x1c4] ss:$8 sps:$4 sm:$0xff]  }
 0x130   : > { %v611_v19 = vpop.f32.mrf.mxu0 }
 0x131   : > { %v612_v20 = vadd.f32 %v611_v19, %v525_v14  ;;  %v621_v22 = vmul.f32 0.01, %v608_v17  ;;  %vm617_vm2 = vcmp.gt.f32.partialorder %v608_v17, 0.0  ;;  %v624_v31 = vsel %vm616_vm3, %v606_v18, %v620_v25  ;;  %v2908_v14 = vld [vmem:[#allocation5 + $0x1d0] ss:$8 sps:$4 sm:$0xff]  }
 0x132   : > { %v613_v21 = vpop.f32.mrf.mxu0  ;;  %v2914_v18 = vld [vmem:[#allocation5 + $0x1c0] ss:$8 sps:$4 sm:$0xff]   ;;  %v2919_v19 = vld [vmem:[#allocation5 + $0xb4] ss:$8 sps:$4 sm:$0xff]  }
 0x133   : > { %vm618_vm1 = vcmp.gt.f32.partialorder %v612_v20, 0.0  ;;  %v622_v23 = vmul.f32 0.01, %v612_v20  ;;  %v614_v24 = vadd.f32 %v613_v21, %v529_v13  ;;  %v625_v28 = vsel %vm617_vm2, %v608_v17, %v621_v22  ;;  %v2905_v13 = vld [vmem:[#allocation5 + $0xd0] ss:$8 sps:$4 sm:$0xff]  }
 0x134   : > { %v2911_v17 = vld [vmem:[#allocation5 + $0xc0] ss:$8 sps:$4 sm:$0xff]   ;;  %v2917_v21 = vld [vmem:[#allocation5 + $0xb0] ss:$8 sps:$4 sm:$0xff]  }
 0x135   : > { %v623_v26 = vmul.f32 0.01, %v614_v24  ;;  %vm619_vm4 = vcmp.gt.f32.partialorder %v614_v24, 0.0  ;;  %v626_v27 = vsel %vm618_vm1, %v612_v20, %v622_v23  ;;  %v2922_v20 = vld [vmem:[#allocation5 + $0x1b4] ss:$8 sps:$4 sm:$0xff]  }
 0x136   : > { %v628_v34 = vpack.c.bf16 %v626_v27, %v624_v31  ;;  %v2920_v22 = vld [vmem:[#allocation5 + $0x1b0] ss:$8 sps:$4 sm:$0xff]   ;;  %v2925_v23 = vld [vmem:[#allocation5 + $0xa4] ss:$8 sps:$4 sm:$0xff]   ;;  %v2923_v25 = vld [vmem:[#allocation5 + $0xa0] ss:$8 sps:$4 sm:$0xff]  }
 0x137   : > { %v627_v29 = vsel %vm619_vm4, %v614_v24, %v623_v26  ;;  %v2928_v24 = vld [vmem:[#allocation5 + $0x1a4] ss:$8 sps:$4 sm:$0xff]   ;;  %v2926_v26 = vld [vmem:[#allocation5 + $0x1a0] ss:$8 sps:$4 sm:$0xff]   ;;  %v2931_v27 = vld [vmem:[#allocation5 + $0x94] ss:$8 sps:$4 sm:$0xff]  }
 0x138   : > { %v629_v30 = vpack.c.bf16 %v627_v29, %v625_v28  ;;  %v2934_v28 = vld [vmem:[#allocation5 + $0x194] ss:$8 sps:$4 sm:$0xff]   ;;  %v2929_v29 = vld [vmem:[#allocation5 + $0x90] ss:$8 sps:$4 sm:$0xff]   ;;  %v2935_v31 = vld [vmem:[#allocation5 + $0x80] ss:$8 sps:$4 sm:$0xff]  }
 0x13a   : > { %1068 = vmatprep.mubr.bf16.mxu1 %v629_v30  ;;  %1111 = vmatprep.mubr.bf16.mxu0 %v629_v30  ;;  %v2932_v30 = vld [vmem:[#allocation5 + $0x190] ss:$8 sps:$4 sm:$0xff]  }
 0x13b   : > { %1069 = vmatmul.mubr.bf16.vlgmr.msra.gmra.mxu1 %v628_v34  ;;  %1112 = vmatmul.mubr.bf16.vlgmr.msra.gmra.mxu0 %v628_v34  ;;  %v2940_v34 = vld [vmem:[#allocation5 + $0x184] ss:$8 sps:$4 sm:$0xff]  }
 0x13c   : > { %1547 = vmatpush1.bf16.msra.mxu1 %v2845_v32  ;;  %1590 = vmatpush1.bf16.msra.mxu0 %v2848_v33  ;;  %v2937_v32 = vld [vmem:[#allocation5 + $0x84] ss:$8 sps:$4 sm:$0xff]   ;;  %v2938_v33 = vld [vmem:[#allocation5 + $0x180] ss:$8 sps:$4 sm:$0xff]  }
 0x13d   : > { %1548 = vmatprep.subr.bf16.mxu1 %v2853_v35  ;;  %1591 = vmatprep.subr.bf16.mxu0 %v2856_v36  ;;  %v2943_v35 = vld [vmem:[#allocation7 + $0x74] ss:$8 sps:$4 sm:$0xff]   ;;  %v694_v36 = vld [vmem:[%s3557_s4] sm:$0xf] }
 0x140   : > { %1549 = vmatpush1.bf16.msra.mxu1 %v2851_v37  ;;  %1592 = vmatpush1.bf16.msra.mxu0 %v2854_v38  ;;  %v710_v37 = vsub.s32 3, %v3454_v9  ;;  %v706_v38 = vsub.s32 2, %v3454_v9 }
 0x141   : > { %1550 = vmatprep.subr.bf16.mxu1 %v2859_v39  ;;  %1593 = vmatprep.subr.bf16.mxu0 %v2862_v40  ;;  %v699_v39 = vrot.slane %v694_v36, %v3460_v11 }
 0x144   : > { %1551 = vmatpush1.bf16.msra.mxu1 %v2857_v41  ;;  %1594 = vmatpush1.bf16.msra.mxu0 %v2860_v42  ;;  %v703_v42 = vrot.slane %v694_v36, %v3457_v10 }
 0x145   : > { %1552 = vmatprep.subr.bf16.mxu1 %v2865_v43  ;;  %1595 = vmatprep.subr.bf16.mxu0 %v2868_v44  ;;  %v711_v43 = vrot.slane %v694_v36, %v710_v37  ;;  %v707_v44 = vrot.slane %v694_v36, %v706_v38  ;;  %v2968_v36 = vld [vmem:[#allocation7 + $0xe0] ss:$8 sps:$4 sm:$0xff]   ;;  %v2973_v37 = vld [vmem:[#allocation7 + $0xd4] ss:$8 sps:$4 sm:$0xff]   ;;  %v2971_v38 = vld [vmem:[#allocation7 + $0xd0] ss:$8 sps:$4 sm:$0xff]  }
 0x148   : > { %1553 = vmatpush1.bf16.msra.mxu1 %v2863_v45  ;;  %1596 = vmatpush1.bf16.msra.mxu0 %v2866_v46 }
 0x149   : > { %1554 = vmatprep.subr.bf16.mxu1 %v2871_v47  ;;  %1597 = vmatprep.subr.bf16.mxu0 %v2874_v48 }
 0x14c   : > { %1555 = vmatpush1.bf16.msra.mxu1 %v2869_v49  ;;  %1598 = vmatpush1.bf16.msra.mxu0 %v2872_v50 }
 0x14d   : > { %1556 = vmatprep.subr.bf16.mxu1 %v2877_v51  ;;  %1599 = vmatprep.subr.bf16.mxu0 %v2880_v52 }
 0x150   : > { %1557 = vmatpush1.bf16.msra.mxu1 %v2875_v53  ;;  %1600 = vmatpush1.bf16.msra.mxu0 %v2878_v54 }
 0x151   : > { %1558 = vmatprep.subr.bf16.mxu1 %v2883_v55  ;;  %1601 = vmatprep.subr.bf16.mxu0 %v2886_v56 }
 0x154   : > { %1559 = vmatpush1.bf16.msra.mxu1 %v2881_v57  ;;  %1602 = vmatpush1.bf16.msra.mxu0 %v2884_v58 }
 0x155   : > { %1560 = vmatprep.subr.bf16.mxu1 %v2889_v59  ;;  %1603 = vmatprep.subr.bf16.mxu0 %v2892_v60 }
 0x158   : > { %1561 = vmatpush1.bf16.msra.mxu1 %v2887_v61  ;;  %1604 = vmatpush1.bf16.msra.mxu0 %v2890_v62 }
 0x159   : > { %1562 = vmatprep.subr.bf16.mxu1 %v2895_v63  ;;  %1605 = vmatprep.subr.bf16.mxu0 %v2898_v1 }
 0x15c   : > { %1563 = vmatpush2.bf16.msra.mxu1 %v2893_v2  ;;  %1606 = vmatpush2.bf16.msra.mxu0 %v2896_v3 }
 0x15d   : > { %1564 = vmatprep.subr.bf16.mxu1 %v2901_v4  ;;  %1607 = vmatprep.subr.bf16.mxu0 %v2904_v5 }
 0x160   : > { %1565 = vmatpush2.bf16.msra.mxu1 %v2899_v6  ;;  %1608 = vmatpush2.bf16.msra.mxu0 %v2902_v7 }
 0x161   : > { %1566 = vmatprep.subr.bf16.mxu1 %v2907_v8  ;;  %1609 = vmatprep.subr.bf16.mxu0 %v2910_v12 }
 0x164   : > { %1567 = vmatpush2.bf16.msra.mxu1 %v2905_v13  ;;  %1610 = vmatpush2.bf16.msra.mxu0 %v2908_v14  ;;  %v2941_v14 = vld [vmem:[#allocation7 + $0x70] ss:$8 sps:$4 sm:$0xff]  }
 0x165   : > { %1568 = vmatprep.subr.bf16.mxu1 %v2913_v15  ;;  %1611 = vmatprep.subr.bf16.mxu0 %v2916_v16 }
 0x168   : > { %1569 = vmatpush2.bf16.msra.mxu1 %v2911_v17  ;;  %1612 = vmatpush2.bf16.msra.mxu0 %v2914_v18  ;;  %v2946_v18 = vld [vmem:[#allocation7 + $0x64] ss:$8 sps:$4 sm:$0xff]  }
 0x169   : > { %1570 = vmatprep.subr.bf16.mxu1 %v2919_v19  ;;  %1613 = vmatprep.subr.bf16.mxu0 %v2922_v20  ;;  %v2944_v20 = vld [vmem:[#allocation7 + $0x60] ss:$8 sps:$4 sm:$0xff]  }
 0x16c   : > { %1571 = vmatpush2.bf16.msra.mxu1 %v2917_v21  ;;  %1614 = vmatpush2.bf16.msra.mxu0 %v2920_v22  ;;  %v2949_v21 = vld [vmem:[#allocation7 + $0x54] ss:$8 sps:$4 sm:$0xff]   ;;  %v2947_v22 = vld [vmem:[#allocation7 + $0x50] ss:$8 sps:$4 sm:$0xff]  }
 0x16d   : > { %1572 = vmatprep.subr.bf16.mxu1 %v2925_v23  ;;  %1615 = vmatprep.subr.bf16.mxu0 %v2928_v24  ;;  %v2952_v23 = vld [vmem:[#allocation7 + $0x44] ss:$8 sps:$4 sm:$0xff]   ;;  %v2950_v24 = vld [vmem:[#allocation7 + $0x40] ss:$8 sps:$4 sm:$0xff]  }
 0x170   : > { %1573 = vmatpush2.bf16.msra.mxu1 %v2923_v25  ;;  %1616 = vmatpush2.bf16.msra.mxu0 %v2926_v26  ;;  %v2955_v25 = vld [vmem:[#allocation7 + $0x34] ss:$8 sps:$4 sm:$0xff]   ;;  %v2953_v26 = vld [vmem:[#allocation7 + $0x30] ss:$8 sps:$4 sm:$0xff]  }
 0x171   : > { %1574 = vmatprep.subr.bf16.mxu1 %v2931_v27  ;;  %1617 = vmatprep.subr.bf16.mxu0 %v2934_v28  ;;  %v2958_v27 = vld [vmem:[#allocation7 + $0x24] ss:$8 sps:$4 sm:$0xff]   ;;  %v2956_v28 = vld [vmem:[#allocation7 + $0x20] ss:$8 sps:$4 sm:$0xff]  }
 0x174   : > { %1575 = vmatpush2.bf16.msra.mxu1 %v2929_v29  ;;  %1618 = vmatpush2.bf16.msra.mxu0 %v2932_v30  ;;  %v2961_v29 = vld [vmem:[#allocation7 + $0x14] ss:$8 sps:$4 sm:$0xff]   ;;  %v2959_v30 = vld [vmem:[#allocation7 + $0x10] ss:$8 sps:$4 sm:$0xff]  }
 0x175   : > { %1576 = vmatprep.subr.bf16.mxu1 %v2937_v32  ;;  %1619 = vmatprep.subr.bf16.mxu0 %v2940_v34  ;;  %v2962_v32 = vld [vmem:[#allocation7] ss:$8 sps:$4 sm:$0xff]   ;;  %v2965_v34 = vld [vmem:[#allocation7 + $0xf0] ss:$8 sps:$4 sm:$0xff]  }
 0x178   : > { %1577 = vmatpush2.bf16.msra.mxu1 %v2935_v31  ;;  %1620 = vmatpush2.bf16.msra.mxu0 %v2938_v33  ;;  %v2964_v31 = vld [vmem:[#allocation7 + $0x4] ss:$8 sps:$4 sm:$0xff]   ;;  %v2967_v33 = vld [vmem:[#allocation7 + $0xf4] ss:$8 sps:$4 sm:$0xff]  }
 0x179   : > { %1850 = vmatprep.subr.bf16.mxu1 %v2943_v35  ;;  %v2970_v35 = vld [vmem:[#allocation7 + $0xe4] ss:$8 sps:$4 sm:$0xff]  }
 0x1fb   : > { %v1070_v40 = vpop.f32.mrf.mxu1  ;;  %v1113_v41 = vpop.f32.mrf.mxu0 }
 0x1fc   : > { %v1071_v47 = vadd.f32 %v1070_v40, %v699_v39  ;;  %v1114_v54 = vadd.f32 %v1113_v41, %v707_v44  ;;  %v2974_v40 = vld [vmem:[#allocation7 + $0xc0] ss:$8 sps:$4 sm:$0xff]   ;;  %v2979_v41 = vld [vmem:[#allocation7 + $0xb4] ss:$8 sps:$4 sm:$0xff]  }
 0x1fd   : > { %v1072_v45 = vpop.f32.mrf.mxu1  ;;  %v1115_v46 = vpop.f32.mrf.mxu0 }
 0x1fe   : > { %v1073_v48 = vadd.f32 %v1072_v45, %v703_v42  ;;  %v1116_v51 = vadd.f32 %v1115_v46, %v711_v43  ;;  %vm1122_vm5 = vcmp.gt.f32.partialorder %v1071_v47, 0.0  ;;  %v1130_v61 = vmul.f32 0.01, %v1071_v47  ;;  %v2985_v45 = vld [vmem:[#allocation7 + $0x94] ss:$8 sps:$4 sm:$0xff]  }
 0x1ff   : > { %v1074_v49 = vpop.f32.mrf.mxu1  ;;  %v1117_v50 = vpop.f32.mrf.mxu0  ;;  %v1132_v63 = vmul.f32 0.01, %v1114_v54  ;;  %vm1124_vm11 = vcmp.gt.f32.partialorder %v1114_v54, 0.0  ;;  %v2983_v46 = vld [vmem:[#allocation7 + $0x90] ss:$8 sps:$4 sm:$0xff]  }
 0x200   : > { %v1075_v52 = vadd.f32 %v1074_v49, %v699_v39  ;;  %v1118_v53 = vadd.f32 %v1117_v50, %v707_v44  ;;  %v1131_v56 = vmul.f32 0.01, %v1073_v48  ;;  %vm1123_vm7 = vcmp.gt.f32.partialorder %v1073_v48, 0.0  ;;  %v2976_v39 = vld [vmem:[#allocation7 + $0xc4] ss:$8 sps:$4 sm:$0xff]   ;;  %v2989_v49 = vld [vmem:[#allocation8 + $0x78] sm:$0xff]  }
 0x201   : > { %v1076_v55 = vpop.f32.mrf.mxu1  ;;  %v1119_v9 = vpop.f32.mrf.mxu0  ;;  %v1133_v62 = vmul.f32 0.01, %v1116_v51  ;;  %vm1125_vm9 = vcmp.gt.f32.partialorder %v1116_v51, 0.0  ;;  %v1138_v7 = vsel %vm1122_vm5, %v1071_v47, %v1130_v61  ;;  %v1140_v15 = vsel %vm1124_vm11, %v1114_v54, %v1132_v63  ;;  %v2980_v44 = vld [vmem:[#allocation7 + $0xa0] ss:$8 sps:$4 sm:$0xff]   ;;  %v2990_v50 = vld [vmem:[#allocation8 + $0x38] sm:$0xff]   ;;  %2595 = vmatprep.subr.bf16.mxu0 %v2989_v49 }
 0x202   : > { %v1134_v57 = vmul.f32 0.01, %v1075_v52  ;;  %vm1126_vm6 = vcmp.gt.f32.partialorder %v1075_v52, 0.0  ;;  %v1136_v58 = vmul.f32 0.01, %v1118_v53  ;;  %v1077_v59 = vadd.f32 %v1076_v55, %v703_v42  ;;  %v2994_v54 = vld [vmem:[#allocation8 + $0x28] sm:$0xff]  }
 0x203   : > { %v1120_v60 = vadd.f32 %v1119_v9, %v711_v43  ;;  %vm1128_vm8 = vcmp.gt.f32.partialorder %v1118_v53, 0.0  ;;  %v1139_v5 = vsel %vm1123_vm7, %v1073_v48, %v1131_v56  ;;  %v1141_v12 = vsel %vm1125_vm9, %v1116_v51, %v1133_v62  ;;  %v2977_v42 = vld [vmem:[#allocation7 + $0xb0] ss:$8 sps:$4 sm:$0xff]   ;;  %v2982_v43 = vld [vmem:[#allocation7 + $0xa4] ss:$8 sps:$4 sm:$0xff]  }
 0x204   : > { %vm1127_vm10 = vcmp.gt.f32.partialorder %v1077_v59, 0.0  ;;  %v1135_v1 = vmul.f32 0.01, %v1077_v59  ;;  %v1142_v2 = vsel %vm1126_vm6, %v1075_v52, %v1134_v57  ;;  %v1144_v4 = vsel %vm1128_vm8, %v1118_v53, %v1136_v58  ;;  %v2986_v47 = vld [vmem:[#allocation7 + $0x80] ss:$8 sps:$4 sm:$0xff]   ;;  %v2991_v51 = vld [vmem:[#allocation8 + $0x70] sm:$0xff]  }
 0x205   : > { %vm1129_vm12 = vcmp.gt.f32.partialorder %v1120_v60, 0.0  ;;  %v1137_v3 = vmul.f32 0.01, %v1120_v60  ;;  %v1146_v16 = vpack.c.bf16 %v1142_v2, %v1138_v7  ;;  %v1148_v19 = vpack.c.bf16 %v1144_v4, %v1140_v15  ;;  %v2988_v48 = vld [vmem:[#allocation7 + $0x84] ss:$8 sps:$4 sm:$0xff]   ;;  %v2992_v52 = vld [vmem:[#allocation8 + $0x30] sm:$0xff]  }
 0x206   : > { %v1143_v6 = vsel %vm1127_vm10, %v1077_v59, %v1135_v1  ;;  %v2993_v53 = vld [vmem:[#allocation8 + $0x68] sm:$0xff]   ;;  %v2995_v55 = vld [vmem:[#allocation8 + $0x60] sm:$0xff]   ;;  %v2997_v56 = vld [vmem:[#allocation8 + $0x58] sm:$0xff]   ;;  %vm3237_vm5 = vmmov 0   ;;  %vm2202_vm8 = vcmask 31744  }
 0x207   : > { %v1147_v8 = vpack.c.bf16 %v1143_v6, %v1139_v5  ;;  %v1145_v13 = vsel %vm1129_vm12, %v1120_v60, %v1137_v3  ;;  %v2996_v9 = vld [vmem:[#allocation8 + $0x20] sm:$0xff]  }
 0x208   : > { %v1149_v17 = vpack.c.bf16 %v1145_v13, %v1141_v12  ;;  %v1214_v57 = vld [vmem:[%s3559_s6] sm:$0x3] }
 0x209   : > { %1578 = vmatprep.mubr.bf16.mxu1 %v1147_v8  ;;  %v1219_v58 = vrot.slane %v1214_v57, %v3460_v11  ;;  %v1223_v59 = vrot.slane %v1214_v57, %v3457_v10  ;;  %v3011_v57 = vld [vmem:[#allocation10 + $0x8] sm:$0xff]  }
 0x20a   : > { %1621 = vmatprep.mubr.bf16.mxu0 %v1149_v17  ;;  %1579 = vmatmul.mubr.bf16.vlgmr.msra.gmra.mxu1 %v1146_v16 }
 0x20b   : > { %1622 = vmatmul.mubr.bf16.vlgmr.msra.gmra.mxu0 %v1148_v19  ;;  %1851 = vmatpush1.bf16.msra.mxu1 %v2941_v14 }
 0x20c   : > { %1852 = vmatprep.subr.bf16.mxu1 %v2946_v18  ;;  %2596 = vmatpush3.bf16.msra.mxu0 %v2990_v50 }
 0x20d   : > { %2597 = vmatprep.subr.bf16.mxu0 %v2991_v51  ;;  %v3005_v51 = vld [vmem:[#allocation10 + $0x38] sm:$0xff]  }
 0x20f   : > { %1853 = vmatpush1.bf16.msra.mxu1 %v2944_v20 }
 0x210   : > { %1854 = vmatprep.subr.bf16.mxu1 %v2949_v21  ;;  %2598 = vmatpush3.bf16.msra.mxu0 %v2992_v52 }
 0x211   : > { %2599 = vmatprep.subr.bf16.mxu0 %v2993_v53  ;;  %v3006_v53 = vld [vmem:[#allocation10 + $0x30] sm:$0xff]  }
 0x213   : > { %1855 = vmatpush1.bf16.msra.mxu1 %v2947_v22 }
 0x214   : > { %1856 = vmatprep.subr.bf16.mxu1 %v2952_v23  ;;  %2600 = vmatpush3.bf16.msra.mxu0 %v2994_v54  ;;  %v3007_v54 = vld [vmem:[#allocation10 + $0x28] sm:$0xff]  }
 0x215   : > { %2601 = vmatprep.subr.bf16.mxu0 %v2995_v55  ;;  %v3008_v55 = vld [vmem:[#allocation10 + $0x20] sm:$0xff]  }
 0x217   : > { %1857 = vmatpush1.bf16.msra.mxu1 %v2950_v24 }
 0x218   : > { %1858 = vmatprep.subr.bf16.mxu1 %v2955_v25  ;;  %2602 = vmatpush3.bf16.msra.mxu0 %v2996_v9  ;;  %v3009_v9 = vld [vmem:[#allocation10 + $0x18] sm:$0xff]  }
 0x219   : > { %2603 = vmatprep.subr.bf16.mxu0 %v2997_v56  ;;  %v3010_v56 = vld [vmem:[#allocation10 + $0x10] sm:$0xff]  }
 0x21b   : > { %1859 = vmatpush1.bf16.msra.mxu1 %v2953_v26  ;;  %v2998_v26 = vld [vmem:[#allocation8 + $0x18] sm:$0xff]  }
 0x21c   : > { %1860 = vmatprep.subr.bf16.mxu1 %v2958_v27  ;;  %2604 = vmatpush3.bf16.msra.mxu0 %v2998_v26  ;;  %v2999_v27 = vld [vmem:[#allocation8 + $0x50] sm:$0xff]  }
 0x21d   : > { %2605 = vmatprep.subr.bf16.mxu0 %v2999_v27 }
 0x21f   : > { %1861 = vmatpush1.bf16.msra.mxu1 %v2956_v28  ;;  %v3000_v28 = vld [vmem:[#allocation8 + $0x10] sm:$0xff]  }
 0x220   : > { %1862 = vmatprep.subr.bf16.mxu1 %v2961_v29  ;;  %2606 = vmatpush3.bf16.msra.mxu0 %v3000_v28  ;;  %v3001_v29 = vld [vmem:[#allocation8 + $0x48] sm:$0xff]  }
 0x221   : > { %2607 = vmatprep.subr.bf16.mxu0 %v3001_v29 }
 0x223   : > { %1863 = vmatpush1.bf16.msra.mxu1 %v2959_v30  ;;  %v3002_v30 = vld [vmem:[#allocation8 + $0x8] sm:$0xff]  }
 0x224   : > { %1864 = vmatprep.subr.bf16.mxu1 %v2964_v31  ;;  %2608 = vmatpush3.bf16.msra.mxu0 %v3002_v30  ;;  %v3003_v31 = vld [vmem:[#allocation8 + $0x40] sm:$0xff]  }
 0x225   : > { %2609 = vmatprep.subr.bf16.mxu0 %v3003_v31 }
 0x227   : > { %1865 = vmatpush1.bf16.msra.mxu1 %v2962_v32  ;;  %v3004_v32 = vld [vmem:[#allocation8] sm:$0xff]  }
 0x228   : > { %1866 = vmatprep.subr.bf16.mxu1 %v2967_v33  ;;  %2610 = vmatpush3.bf16.msra.mxu0 %v3004_v32  ;;  %v1678_v33 = vld [vmem:[%s3561_s8] sm:$0x3] }
 0x229   : > { %2626 = vmatprep.subr.bf16.mxu0 %v3236_v0 }
 0x22b   : > { %1867 = vmatpush2.bf16.msra.mxu1 %v2965_v34  ;;  %v1687_v34 = vrot.slane %v1678_v33, %v3457_v10 }
 0x22c   : > { %1868 = vmatprep.subr.bf16.mxu1 %v2970_v35  ;;  %v1683_v35 = vrot.slane %v1678_v33, %v3460_v11 }
 0x22f   : > { %1869 = vmatpush2.bf16.msra.mxu1 %v2968_v36 }
 0x230   : > { %1870 = vmatprep.subr.bf16.mxu1 %v2973_v37 }
 0x233   : > { %1871 = vmatpush2.bf16.msra.mxu1 %v2971_v38 }
 0x234   : > { %1872 = vmatprep.subr.bf16.mxu1 %v2976_v39 }
 0x237   : > { %1873 = vmatpush2.bf16.msra.mxu1 %v2974_v40 }
 0x238   : > { %1874 = vmatprep.subr.bf16.mxu1 %v2979_v41 }
 0x23b   : > { %1875 = vmatpush2.bf16.msra.mxu1 %v2977_v42 }
 0x23c   : > { %1876 = vmatprep.subr.bf16.mxu1 %v2982_v43 }
 0x23f   : > { %1877 = vmatpush2.bf16.msra.mxu1 %v2980_v44 }
 0x240   : > { %1878 = vmatprep.subr.bf16.mxu1 %v2985_v45 }
 0x243   : > { %1879 = vmatpush2.bf16.msra.mxu1 %v2983_v46 }
 0x244   : > { %1880 = vmatprep.subr.bf16.mxu1 %v2988_v48 }
 0x247   : > { %1881 = vmatpush2.bf16.msra.mxu1 %v2986_v47 }
 0x2ca   : > { %v1580_v60 = vpop.f32.mrf.mxu1 }
 0x2cb   : > { %v1623_v61 = vpop.f32.mrf.mxu0  ;;  %v1581_v63 = vadd.f32 %v1580_v60, %v1219_v58  ;;  %v2563_v60 = vld [vmem:[%s3563_s10] ss:$0 sm:$0xff] }
 0x2cc   : > { %v1582_v62 = vpop.f32.mrf.mxu1 }
 0x2cd   : > { %v1583_v1 = vadd.f32 %v1582_v62, %v1223_v59  ;;  %v1625_v2 = vpop.f32.mrf.mxu0  ;;  %v1624_v8 = vadd.f32 %v1623_v61, %v1581_v63 }
 0x2ce   : > { %v1584_v3 = vpop.f32.mrf.mxu1 }
 0x2cf   : > { %v1585_v4 = vadd.f32 %v1584_v3, %v1219_v58  ;;  %v1627_v5 = vpop.f32.mrf.mxu0  ;;  %v1626_v6 = vadd.f32 %v1625_v2, %v1583_v1  ;;  %v1636_v18 = vmul.f32 0.01, %v1624_v8  ;;  %vm1632_vm15 = vcmp.gt.f32.partialorder %v1624_v8, 0.0  ;;  %v3012_v58 = vld [vmem:[#allocation10] sm:$0xff]  }
 0x2d0   : > { %v1586_v7 = vpop.f32.mrf.mxu1 }
 0x2d1   : > { %v1628_v12 = vadd.f32 %v1627_v5, %v1585_v4  ;;  %v1587_v13 = vadd.f32 %v1586_v7, %v1223_v59  ;;  %v1629_v15 = vpop.f32.mrf.mxu0  ;;  %v1637_v16 = vmul.f32 0.01, %v1626_v6  ;;  %vm1633_vm14 = vcmp.gt.f32.partialorder %v1626_v6, 0.0 }
 0x2d2   : > { %v1640_v23 = vsel %vm1632_vm15, %v1624_v8, %v1636_v18 }
 0x2d3   : > { %v1638_v14 = vmul.f32 0.01, %v1628_v12  ;;  %vm1634_vm13 = vcmp.gt.f32.partialorder %v1628_v12, 0.0  ;;  %v1630_v17 = vadd.f32 %v1629_v15, %v1587_v13  ;;  %v1641_v21 = vsel %vm1633_vm14, %v1626_v6, %v1637_v16  ;;  %v2580_v13 = vld [vmem:[%s3565_s12] ss:$0 sm:$0xff] }
 0x2d5   : > { %vm1635_vm0 = vcmp.gt.f32.partialorder %v1630_v17, 0.0  ;;  %v1639_v19 = vmul.f32 0.01, %v1630_v17  ;;  %v1642_v20 = vsel %vm1634_vm13, %v1628_v12, %v1638_v14 }
 0x2d6   : > { %v1644_v25 = vpack.c.bf16 %v1642_v20, %v1640_v23 }
 0x2d7   : > { %v1643_v22 = vsel %vm1635_vm0, %v1630_v17, %v1639_v19 }
 0x2d8   : > { %v1645_v24 = vpack.c.bf16 %v1643_v22, %v1641_v21 }
 0x2da   : > { %1882 = vmatprep.mubr.bf16.mxu1 %v1645_v24 }
 0x2db   : > { %1883 = vmatmul.mubr.bf16.vlgmr.msra.gmra.mxu1 %v1644_v25 }
 0x39b   : > { %v1884_v36 = vpop.f32.mrf.mxu1 }
 0x39c   : > { %v1885_v39 = vadd.f32 %v1884_v36, %v1683_v35 }
 0x39d   : > { %v1886_v37 = vpop.f32.mrf.mxu1 }
 0x39e   : > { %v1887_v38 = vadd.f32 %v1886_v37, %v1687_v34  ;;  %v1897_v46 = vmul.f32 0.01, %v1885_v39  ;;  %vm1893_vm3 = vcmp.gt.f32.partialorder %v1885_v39, 0.0 }
 0x39f   : > { %v1888_v40 = vpop.f32.mrf.mxu1 }
 0x3a0   : > { %v1889_v41 = vadd.f32 %v1888_v40, %v1683_v35  ;;  %v1898_v43 = vmul.f32 0.01, %v1887_v38  ;;  %vm1894_vm2 = vcmp.gt.f32.partialorder %v1887_v38, 0.0  ;;  %v1901_v11 = vsel %vm1893_vm3, %v1885_v39, %v1897_v46 }
 0x3a1   : > { %v1890_v42 = vpop.f32.mrf.mxu1 }
 0x3a2   : > { %vm1895_vm1 = vcmp.gt.f32.partialorder %v1889_v41, 0.0  ;;  %v1899_v44 = vmul.f32 0.01, %v1889_v41  ;;  %v1891_v45 = vadd.f32 %v1890_v42, %v1687_v34  ;;  %v1902_v10 = vsel %vm1894_vm2, %v1887_v38, %v1898_v43 }
 0x3a4   : > { %vm1896_vm4 = vcmp.gt.f32.partialorder %v1891_v45, 0.0  ;;  %v1900_v47 = vmul.f32 0.01, %v1891_v45  ;;  %v1903_v48 = vsel %vm1895_vm1, %v1889_v41, %v1899_v44 }
 0x3a5   : > { %v1905_v52 = vpack.c.bf16 %v1903_v48, %v1901_v11 }
 0x3a6   : > { %v1904_v49 = vsel %vm1896_vm4, %v1891_v45, %v1900_v47 }
 0x3a7   : > { %v1906_v50 = vpack.c.bf16 %v1904_v49, %v1902_v10 }
 0x3a9   : > { %2074 = vmatprep.mubr.bf16.mxu0 %v1906_v50 }
 0x3aa   : > { %2075 = vmatmul.mubr.bf16.vlgmr.msra.gmra.mxu0 %v1905_v52 }
 0x3ab   : > { %2627 = vmatpush3.bf16.msra.mxu0 %v3005_v51  ;;  %2642 = vmatprep.mubr.msk.bf16.mxu0 %vm3237_vm5, %v3236_v0 }
 0x3ac   : > { %2628 = vmatprep.subr.bf16.mxu0 %v3236_v0 }
 0x3af   : > { %2629 = vmatpush3.bf16.msra.mxu0 %v3006_v53 }
 0x3b0   : > { %2630 = vmatprep.subr.bf16.mxu0 %v3236_v0 }
 0x3b3   : > { %2631 = vmatpush3.bf16.msra.mxu0 %v3007_v54 }
 0x3b4   : > { %2632 = vmatprep.subr.bf16.mxu0 %v3236_v0 }
 0x3b7   : > { %2633 = vmatpush3.bf16.msra.mxu0 %v3008_v55 }
 0x3b8   : > { %2634 = vmatprep.subr.bf16.mxu0 %v3236_v0 }
 0x3bb   : > { %2635 = vmatpush3.bf16.msra.mxu0 %v3009_v9 }
 0x3bc   : > { %2636 = vmatprep.subr.bf16.mxu0 %v3236_v0 }
 0x3bf   : > { %2637 = vmatpush3.bf16.msra.mxu0 %v3010_v56 }
 0x3c0   : > { %2638 = vmatprep.subr.bf16.mxu0 %v3236_v0 }
 0x3c3   : > { %2639 = vmatpush3.bf16.msra.mxu0 %v3011_v57 }
 0x3c4   : > { %2640 = vmatprep.subr.bf16.mxu0 %v3236_v0  ;;  %v3238_v0 = vmov 4  }
 0x3c5   : > { %2747 = vset.pattern.permute.xlu0 %v3238_v0  ;;  %2748 = vset.pattern.permute.xlu1 %v3238_v0 }
 0x3c7   : > { %2641 = vmatpush3.bf16.msra.mxu0 %v3012_v58 }
 0x46a   : > { %v2611_v59 = vpop.f32.mrf.mxu0 }
 0x46c   : > { %v2612_v61 = vpop.f32.mrf.mxu0 }
 0x46d   : > { %v2613_v62 = vadd.f32 %v2612_v61, %v2611_v59 }
 0x46e   : > { %v2614_v63 = vpop.f32.mrf.mxu0 }
 0x46f   : > { %v2077_v1 = vadd.f32 %v2613_v62, %v2563_v60 }
 0x470   : > { %v2615_v2 = vpop.f32.mrf.mxu0 }
 0x471   : > { %v2616_v3 = vadd.f32 %v2615_v2, %v2614_v63  ;;  %v2085_v4 = vmul.f32 0.01, %v2077_v1  ;;  %vm2083_vm6 = vcmp.gt.f32.partialorder %v2077_v1, 0.0 }
 0x473   : > { %v2080_v5 = vadd.f32 %v2616_v3, %v2563_v60  ;;  %v2087_v7 = vsel %vm2083_vm6, %v2077_v1, %v2085_v4 }
 0x475   : > { %vm2084_vm7 = vcmp.gt.f32.partialorder %v2080_v5, 0.0  ;;  %v2086_v6 = vmul.f32 0.01, %v2080_v5 }
 0x477   : > { %v2088_v8 = vsel %vm2084_vm7, %v2080_v5, %v2086_v6 }
 0x478   : > { %v2089_v12 = vpack.c.bf16 %v2088_v8, %v2087_v7 }
 0x47a   : > { %2643 = vmatmul.mubr.bf16.vlgmr.msra.gmra.mxu0 %v2089_v12 }
 0x53a   : > { %v2195_v14 = vpop.f32.mrf.mxu0 }
 0x53b   : > { %v2196_v15 = vadd.f32 %v2580_v13, %v2195_v14 }
 0x53c   : > { %v2644_v16 = vpop.f32.mrf.mxu0 }
 0x53d   : > { %v2203_v17 = vsel %vm2202_vm8, %v2196_v15, 0.0 }
 0x53e   : > { %2204 = vadd.xlane.f32.xlu0 %v2203_v17  ;;  %v2198_v18 = vpop.f32.mrf.mxu0 }
 0x53f   : > { %v2199_v19 = vadd.f32 %v2580_v13, %v2198_v18 }
 0x540   : > { %v2645_v20 = vpop.f32.mrf.mxu0 }
 0x541   : > { %v2206_v21 = vsel %vm2202_vm8, %v2199_v19, 0.0 }
 0x542   : > { %2207 = vadd.xlane.f32.xlu0 %v2206_v21 }
 0x558   : > { %2246 = vperm.xlu0 %2747, %v2196_v15  }
 0x5c7   : > { %v2205_v22 = vpop.xlane.xlu0 %2204 }
 0x5c8   : > { %v2210_v23 = vmul.f32 0.25, %v2205_v22 }
 0x5ca   : > { %v2212_v24 = vsub.f32 %v2196_v15, %v2210_v23 }
 0x5cb   : > { %v2208_v25 = vpop.xlane.xlu0 %2207 }
 0x5cc   : > { %v2211_v26 = vmul.f32 0.25, %v2208_v25  ;;  %v2214_v27 = vmul.f32 %v2212_v24, %v2212_v24 }
 0x5ce   : > { %v2213_v28 = vsub.f32 %v2199_v19, %v2211_v26  ;;  %v2216_v29 = vsel %vm2202_vm8, %v2214_v27, 0.0 }
 0x5cf   : > { %2217 = vadd.xlane.f32.xlu1 %v2216_v29 }
 0x5d0   : > { %v2215_v30 = vmul.f32 %v2213_v28, %v2213_v28 }
 0x5d2   : > { %v2219_v31 = vsel %vm2202_vm8, %v2215_v30, 0.0 }
 0x5d3   : > { %2220 = vadd.xlane.f32.xlu1 %v2219_v31  ;;  %v2247_v49 = vpop.permute.xlu0 %2246 }
 0x5e4   : > { %2251 = vperm.xlu1 %2748, %v2199_v19  }
 0x658   : > { %v2218_v32 = vpop.xlane.xlu1 %2217 }
 0x659   : > { %v2222_v33 = vmul.f32 0.33333334, %v2218_v32 }
 0x65b   : > { %3013 = vrsqrt.f32 %v2222_v33  ;;  %vm2226_vm9 = vcmp.eq.f32.partialorder %v2222_v33, inf  ;;  %v2229_v38 = vand.u32 2147483648, %v2222_v33  ;;  %vm2228_vm10 = vcmp.eq.f32.partialorder %v2222_v33, 0.0 }
 0x65c   : > { %v2221_v34 = vpop.xlane.xlu1 %2220 }
 0x65d   : > { %v2223_v35 = vmul.f32 0.33333334, %v2221_v34 }
 0x65f   : > { %3015 = vrsqrt.f32 %v2223_v35  ;;  %vm2233_vm11 = vcmp.eq.f32.partialorder %v2223_v35, inf  ;;  %v2236_v44 = vand.u32 2147483648, %v2223_v35  ;;  %vm2235_vm12 = vcmp.eq.f32.partialorder %v2223_v35, 0.0 }
 0x660   : > { %v2252_v52 = vpop.permute.xlu1 %2251 }
 0x668   : > { %v3014_v36 = vpop.eup %3013 }
 0x669   : > { %v2225_v37 = vmul.f32 %v3014_v36, %v2222_v33 }
 0x66b   : > { %v2227_v39 = vsel %vm2226_vm9, %v2222_v33, %v2225_v37 }
 0x66c   : > { %v3016_v40 = vpop.eup %3015  ;;  %v2230_v41 = vsel %vm2228_vm10, %v2229_v38, %v2227_v39 }
 0x66d   : > { %v2238_v42 = vadd.f32 1e-06, %v2230_v41  ;;  %v2232_v43 = vmul.f32 %v3016_v40, %v2223_v35 }
 0x66f   : > { %3017 = vrcp.f32 %v2238_v42  ;;  %v2234_v45 = vsel %vm2233_vm11, %v2223_v35, %v2232_v43 }
 0x670   : > { %v2237_v46 = vsel %vm2235_vm12, %v2236_v44, %v2234_v45 }
 0x671   : > { %v2239_v47 = vadd.f32 1e-06, %v2237_v46 }
 0x673   : > { %3019 = vrcp.f32 %v2239_v47 }
 0x67c   : > { %v3018_v48 = vpop.eup %3017 }
 0x67d   : > { %v2242_v10 = vmul.f32 %v3018_v48, %v2212_v24 }
 0x67f   : > { %v2254_v11 = vadd.f32 %v2247_v49, %v2242_v10 }
 0x680   : > { %v3020_v50 = vpop.eup %3019 }
 0x681   : > { %v2243_v51 = vmul.f32 %v3020_v50, %v2213_v28  ;;  %2256 = vst [vmem:[%s507_s16] sm:$0xff] %v2254_v11 }
 0x683   : > { %v2255_v53 = vadd.f32 %v2252_v52, %v2243_v51 }
 0x685   : > { %2257 = vst [vmem:[%s507_s16 + $0x8] sm:$0xff] %v2255_v53 }
 0x686   : > { %3164 = shalt.err (!%p3161_p3)
}
 0x687   : > { %s3165_s24 = scalar_lea.hbm %s3511_s19, 256  ;;  %s3169_s21 = scalar_lea.hbm %s3566_s13, 512 }
 0x688   : > { %p3166_p9 = scmp.ne.s32.totalorder %s3511_s19, %s3165_s24  ;;  %p3170_p12 = scmp.lt.s32.totalorder %s3511_s19, %s3566_s13 }
 0x689   : > { %p3171_p10 = scmp.lt.s32.totalorder %s3169_s21, %s3165_s24 }
 0x68a   : > { %p3167_p2 = pnand %p3166_p9, %p3350_p5 }
 0x68b   : > { %p3172_p7 = por %p3171_p10, %p3170_p12 }
 0x68c   : > { %p3168_p4 = pneg %p3167_p2 }
 0x68e   : > { %p3173_p8 = pnand %p3172_p7, %p3168_p4 }
 0x690   : > { %3176 = shalt.err (!%p3173_p8)
}
 0x691   : > { %s3240_s30 = smov 128   ;;  %s3241_s17 = smov 8  }
 0x692   : > { %2666 = dma.vmem_to_hbm [thread:$0]  (%p3350_p5), %s3506_s9, 256, %s3511_s19, %s3513_s20, %s3240_s30, %s3240_s30, %s3241_s17  }
 0x693 PF: > { %p2698_p0 = scmp.ge.s32.totalorder %s3223_s28, 2  ;;  %s2287_s29 = sand.u32 1, %s3211_s25  }
 0x694   : > { %s2288_s15 = scalar_lea.sflag [#allocation4], %s2287_s29 }
 0x695   : > { %p2685_p11 = pnand %p2698_p0, %p3354_p6 }
 0x697   : > { %p2686_p1 = pneg %p2685_p11 }
 0x699   : > { %3206 = dma.done.wait (%p2686_p1), %s2288_s15, 256  }
 0x69a   : > { %3208 = vsyncadd (%p2686_p1), %s2288_s15, 4294967040  ;;  %s3600_s28 = sld [smem:[#allocation17_spill]]  ;;  %s3603_s25 = smov %s3215_s26 }
 0x69b   : > { %s3601_s22 = sld [smem:[#allocation16_spill]] }
 0x69c   : > { %s3602_s27 = sld [smem:[#allocation18_spill]] }
 0x6a0   : > { %p26_p13 = scmp.ge.s32.totalorder %s3600_s28, 4  }
 0x6a1   : > { %s3604_s26 = smov %s3601_s22 }
 0x6a2   :  { %28 = sbr.rel (!%p26_p13) target bundleno = 9 (0x9), region = 128 }
 0x6a7   :  { %2293 = vsyncpa [#allocation3], 1 }
 0x6a8   :  { %2295 = vsyncpa [#allocation3 + $0x1], 1 }
 0x6a9   :  { %2296 = vsyncpa [#allocation6], 1 }
 0x6aa   :  { %2297 = vsyncpa [#allocation9], 1 }
 0x6ab   :  { %2298 = vsyncpa [#allocation4], 1 }
 0x6ac   :  { %2300 = vsyncpa [#allocation4 + $0x1], 1 }

</bundles_post_ra>
